<compile_context>
chip_gen: v6e
topology: v6e:2x2x1
jax: 0.10.0
libtpu: 0.0.40
codegen_flags: <defaults>
</compile_context>

<pallas_src>
import functools

import jax
import jax.numpy as jnp
from jax import lax
from jax.experimental import pallas as pl
from jax.experimental.pallas import tpu as pltpu


# ----------------------------------------------------------------------------
# Fused Pallas kernel: energy matmul + softmax + attn@V + value conv + residual
# ----------------------------------------------------------------------------
def _attn_fused_kernel(d_ref, x_ref, kaug_ref, wv_ref, bv_ref, wo_ref, bo_ref,
                       o_ref, *, cdim):
    d = d_ref[0]        # [N, C+1]  bf16  domain features, rows (t,h,w), ones col
    kaug = kaug_ref[0]  # [C+1, N]  bf16  [Wq; bq] @ scrambled key
    xc = x_ref[0]       # [C, N]    f32   x, channel-first, cols (t,h,w)

    # Energy: q-projection + q-bias folded into one K=33 bf16 MXU matmul.
    energy = jnp.dot(d, kaug, preferred_element_type=jnp.float32)   # [N, N] f32

    # Softmax numerator: one fused pass over the [N, N] tile
    # (XLU row-max, VPU subtract, EUP exp); energy is not rematerialized.
    mrow = jnp.max(energy, axis=-1, keepdims=True)
    p = jnp.exp(energy - mrow)                                      # [N, N]

    # v projection (channel-first).  The appended all-ones row makes the same
    # attn@V matmul also emit the softmax denominator (deferred normalization).
    vaug = (jnp.dot(wv_ref[...], xc, preferred_element_type=jnp.float32)
            + bv_ref[...])                                          # [c+1, N]

    # attn@V: p is the canonical [M, K] LHS (contract its LAST dim) so the
    # 64-vreg p tile needs no relayout; only the tiny v_aug is transposed.
    acc = lax.dot_general(p, vaug, (((1,), (1,)), ((), ())),
                          preferred_element_type=jnp.float32)       # [N, c+1]
    att = acc[:, :cdim] * pl.reciprocal(acc[:, cdim:cdim + 1], approx=True)

    # gamma-folded value conv (contract last dims; att [N,c] is tiny) +
    # residual.  Output is channel-first [C, N=256] so the store is lane-dense.
    out = lax.dot_general(wo_ref[...], att, (((1,), (1,)), ((), ())),
                          preferred_element_type=jnp.float32)       # [C, N]
    o_ref[0] = (out + bo_ref[...] + xc).astype(o_ref.dtype)


def attention_fused_pallas(d_aug, x_cf, k_aug, wv_aug, bv_aug, wo, bo):
    """d_aug:[B,N,C+1]bf16, x_cf:[B,C,N]f32, k_aug:[B,C+1,N]bf16 -> [B,C,N]f32."""
    B, N, Ca = d_aug.shape
    _, C, _ = x_cf.shape
    cdim = wo.shape[1]
    caug = wv_aug.shape[0]
    kernel = functools.partial(_attn_fused_kernel, cdim=cdim)
    return pl.pallas_call(
        kernel,
        out_shape=jax.ShapeDtypeStruct((B, C, N), jnp.float32),
        grid=(B,),
        in_specs=[
            pl.BlockSpec((1, N, Ca), lambda i: (i, 0, 0)),   # d_aug
            pl.BlockSpec((1, C, N), lambda i: (i, 0, 0)),    # x_cf (f32 residual)
            pl.BlockSpec((1, Ca, N), lambda i: (i, 0, 0)),   # k_aug
            pl.BlockSpec((caug, C), lambda i: (0, 0)),       # wv_aug
            pl.BlockSpec((caug, 1), lambda i: (0, 0)),       # bv_aug (ones row)
            pl.BlockSpec((C, cdim), lambda i: (0, 0)),       # wo (gamma-folded)
            pl.BlockSpec((C, 1), lambda i: (0, 0)),          # bo (gamma-folded)
        ],
        out_specs=pl.BlockSpec((1, C, N), lambda i: (i, 0, 0)),
        compiler_params=pltpu.CompilerParams(
            dimension_semantics=("parallel",),
            vmem_limit_bytes=32 * 1024 * 1024),
    )(d_aug, x_cf, k_aug, wv_aug, bv_aug, wo, bo)


# ----------------------------------------------------------------------------
# Host-side weight folding (exact: the domain branch is a pure affine chain)
# ----------------------------------------------------------------------------
def _fold_domain_q(p):
    wd1, bd1 = p["l1_down_w"], p["l1_down_b"]
    wu1, bu1 = p["l1_up_w"], p["l1_up_b"]
    wd2, bd2 = p["l2_down_w"], p["l2_down_b"]
    wu2, bu2 = p["l2_up_w"], p["l2_up_b"]
    w1, b1 = p["conv1_w"], p["conv1_b"]
    wq = w1 @ wu2 @ wd2 @ wu1 @ wd1                                       # [c, C]
    bq = b1 + w1 @ (bu2 + wu2 @ (bd2 + wd2 @ (bu1 + wu1 @ bd1)))          # [c]
    return wq, bq


# ----------------------------------------------------------------------------
# Self_Attn forward (matches the PyTorch module semantics)
# ----------------------------------------------------------------------------
def self_attn_forward(params, x, domainX, *, in_dim, batch_size, num_frames,
                      width, height, channels):
    BT, C, H, W = x.shape
    B, T = batch_size, num_frames
    N = T * H * W
    c = channels

    # -- fold linear chains host-side (tiny ops, fused by XLA under jit) --
    wq, bq = _fold_domain_q(params)                     # domain branch + conv1
    wo_g = params["gamma"] * params["value_w"]          # [C, c] gamma-folded
    bo_g = params["gamma"] * params["value_b"]          # [C]
    wv_aug = jnp.concatenate(
        [params["conv3_w"], jnp.zeros((1, C), jnp.float32)], axis=0)      # [c+1, C]
    bv_aug = jnp.concatenate(
        [params["conv3_b"], jnp.ones((1,), jnp.float32)], axis=0)         # [c+1]

    # -- one-time layout prep (small XLA transpose passes) --
    x5 = x.reshape(B, T, C, H, W)
    d5 = domainX.reshape(B, T, C, H, W)
    d_cl = jnp.transpose(d5, (0, 1, 3, 4, 2)).reshape(B, N, C)   # rows (t,h,w)
    x_cf = jnp.transpose(x5, (0, 2, 1, 3, 4)).reshape(B, C, N)   # channel-first
    xk = jnp.transpose(x5, (0, 3, 1, 4, 2)).reshape(B, N, C)     # rows (h,t,w)

    # -- k projection as plain XLA (fuses with the transposes).  Because xk's
    #    rows are (h,t,w)-ordered with channel last, the torch
    #    "[B,H,T,W,c] -> [B, channels, T*W*H]" key scramble is a free
    #    contiguous reshape here (column ordering preserved exactly). --
    kpre = jnp.einsum('bnc,dc->bnd', xk, params["conv2_w"]) + params["conv2_b"]
    k_s = kpre.reshape(B, c, N)                                   # scrambled key

    # -- re-associated q path:  energy = [d | 1] @ ([Wq; bq] @ k_s) --
    wq_aug = jnp.concatenate([wq.T, bq[None, :]], axis=0)         # [C+1, c]
    k_aug = jnp.einsum('dc,bcn->bdn', wq_aug, k_s).astype(jnp.bfloat16)   # [B,C+1,N]
    d_aug = jnp.concatenate(
        [d_cl, jnp.ones((B, N, 1), jnp.float32)], axis=-1).astype(jnp.bfloat16)
    # NOTE: d_aug keeps C+1=33 on the lane axis (25% lane density); harmless at
    # this size and keeps it the canonical MXU LHS with no in-kernel transpose.

    # -- fused energy / softmax / attn@V / value-conv / residual kernel --
    out_cf = attention_fused_pallas(
        d_aug, x_cf, k_aug,
        wv_aug, bv_aug.reshape(c + 1, 1),
        wo_g, bo_g.reshape(C, 1))                                 # [B, C, N]

    out = jnp.transpose(out_cf.reshape(B, C, T, H, W),
                        (0, 2, 1, 3, 4)).reshape(BT, C, H, W)
    return out


# ----------------------------------------------------------------------------
# Pure-JAX reference (literal, per-layer translation of the PyTorch module)
# ----------------------------------------------------------------------------
def reference_forward(params, x, domainX, *, in_dim, batch_size, num_frames,
                      width, height, channels):
    B, T, C, c = batch_size, num_frames, in_dim, channels
    BT, _, H, W = x.shape
    hp = jax.lax.Precision.HIGHEST

    def conv2d(z, w, b):
        return jnp.einsum('oc,bchw->bohw', w, z, precision=hp) + b[None, :, None, None]

    def conv3d(z, w, b):
        return jnp.einsum('oc,bcthw->bothw', w, z, precision=hp) + b[None, :, None, None, None]

    temp = x
    d = conv2d(domainX, params["l1_down_w"], params["l1_down_b"])
    d = d.reshape(B, T, c, H, W).transpose(0, 2, 1, 3, 4)
    d = conv3d(d, params["l1_up_w"], params["l1_up_b"])
    d = d.transpose(0, 2, 1, 3, 4).reshape(BT, C, H, W)
    d = conv2d(d, params["l2_down_w"], params["l2_down_b"])
    d = d.reshape(B, T, c, H, W).transpose(0, 2, 1, 3, 4)
    d = conv3d(d, params["l2_up_w"], params["l2_up_b"])
    d = d.transpose(0, 2, 1, 3, 4).reshape(BT, C, H, W)

    q = conv2d(d, params["conv1_w"], params["conv1_b"])
    q = q.reshape(B, T, c, H, W).transpose(0, 1, 3, 4, 2).reshape(B, T * H * W, c)

    k = conv2d(x, params["conv2_w"], params["conv2_b"])
    k = k.reshape(B, T, c, H, W).transpose(0, 1, 3, 4, 2)
    k = k.transpose(0, 2, 1, 3, 4).reshape(B, c, T * H * W)       # torch scramble

    v = conv2d(x, params["conv3_w"], params["conv3_b"])
    v = v.reshape(B, T, c, H, W).transpose(0, 1, 3, 4, 2).reshape(B, T * H * W, c)

    energy = jnp.einsum('bnc,bcm->bnm', q, k, precision=hp)
    attn = jax.nn.softmax(energy, axis=-1)
    out = jnp.einsum('bnm,bmc->bnc', attn, v, precision=hp)
    out = out.reshape(B, T, H, W, c).transpose(0, 4, 1, 2, 3)
    out = conv3d(out, params["value_w"], params["value_b"])
    out = out.transpose(0, 2, 1, 3, 4).reshape(BT, C, H, W)
    return params["gamma"] * out + temp


# ----------------------------------------------------------------------------
# Deterministic parameter construction (mirrors Self_Attn.__init__)
# ----------------------------------------------------------------------------
def init_params(key, in_dim):
    r = 8
    c = in_dim // r
    ks = jax.random.split(key, 12)

    def w2d(k, cout, cin):
        return jax.random.normal(k, (cout, cin), jnp.float32) * 0.05

    def bias(k, cout):
        return jax.random.normal(k, (cout,), jnp.float32) * 0.05

    conv1_w = w2d(ks[0], c, in_dim)
    conv2_w = w2d(ks[1], c, in_dim)
    conv3_w = w2d(ks[2], c, in_dim)
    value_w = w2d(ks[3], in_dim, c)
    l2_down_w = w2d(ks[4], c, in_dim)
    l2_up_w = w2d(ks[5], in_dim, c)
    layer2_downgama = jnp.zeros((1,), jnp.float32)
    layer2_upgamma = jnp.zeros((1,), jnp.float32)

    return {
        "conv1_w": conv1_w, "conv1_b": bias(ks[6], c),
        "conv2_w": conv2_w, "conv2_b": bias(ks[7], c),
        "conv3_w": conv3_w, "conv3_b": bias(ks[8], c),
        "value_w": value_w, "value_b": bias(ks[9], in_dim),
        # layer1_{down,up}conv share weights with conv1 / value_conv, new biases
        "l1_down_w": conv1_w, "l1_down_b": bias(ks[10], c),
        "l1_up_w": value_w, "l1_up_b": bias(ks[11], in_dim),
        # layer2 weights = own init + gamma(=0) * layer1 weights
        "l2_down_w": l2_down_w + layer2_downgama * conv1_w,
        "l2_down_b": bias(jax.random.fold_in(key, 100), c),
        "l2_up_w": l2_up_w + layer2_upgamma * value_w,
        "l2_up_b": bias(jax.random.fold_in(key, 101), in_dim),
        "gamma": jnp.zeros((1,), jnp.float32),
    }


# ----------------------------------------------------------------------------
if __name__ == "__main__":
    # Module hardcodes batch_size=4 and num_frames=16 (slices 0:16..48:64).
    in_dim = 32
    batch_size = 4
    num_frames = 16
    width = height = 4
    channels = in_dim // 8

    key = jax.random.PRNGKey(0)
    kx, kd, kp = jax.random.split(key, 3)
    x = jax.random.normal(kx, (batch_size * num_frames, in_dim, height, width),
                          jnp.float32)
    domainX = jax.random.normal(kd, (batch_size * num_frames, in_dim, height, width),
                                jnp.float32)
    params = init_params(kp, in_dim)

    kwargs = dict(in_dim=in_dim, batch_size=batch_size, num_frames=num_frames,
                  width=width, height=height, channels=channels)
    fwd = jax.jit(functools.partial(self_attn_forward, **kwargs))
    ref = jax.jit(functools.partial(reference_forward, **kwargs))

    # 1) gamma = 0 (module init state): output must equal the residual input.
    out0 = jax.block_until_ready(fwd(params, x, domainX))
    assert out0.shape == x.shape, (out0.shape, x.shape)
    assert bool(jnp.allclose(out0, x, atol=1e-5)), "residual check failed"

    # 2) non-zero gamma: fused Pallas path vs. literal pure-JAX reference.
    params_g = dict(params)
    params_g["gamma"] = jnp.full((1,), 0.5, jnp.float32)
    out1 = jax.block_until_ready(fwd(params_g, x, domainX))
    ref1 = jax.block_until_ready(ref(params_g, x, domainX))
    max_err = float(jnp.max(jnp.abs(out1 - ref1)))
    assert max_err < 2e-3, f"mismatch vs reference: {max_err}"
    assert bool(jnp.all(jnp.isfinite(out1)))

    print("KERNEL_OK")
</pallas_src>

<mosaic_0001>
module attributes {stable_mosaic.version = 11 : i64} {
  func.func @_attn_fused_kernel(%arg0: i32, %arg1: memref<1x256x33xbf16, #tpu.memory_space<vmem>>, %arg2: memref<1x32x256xf32, #tpu.memory_space<vmem>>, %arg3: memref<1x33x256xbf16, #tpu.memory_space<vmem>>, %arg4: memref<5x32xf32, #tpu.memory_space<vmem>>, %arg5: memref<5x1xf32, #tpu.memory_space<vmem>>, %arg6: memref<32x4xf32, #tpu.memory_space<vmem>>, %arg7: memref<32x1xf32, #tpu.memory_space<vmem>>, %arg8: memref<1x32x256xf32, #tpu.memory_space<vmem>>) attributes {dimension_semantics = [#tpu.dimension_semantics<parallel>], iteration_bounds = array<i64: 4>, scalar_prefetch = 0 : i64, scratch_operands = 0 : i64, tpu.core_type = #tpu.core_type<tc>, window_params = [{transform_indices = @transform_0, window_bounds = array<i64: 1, 256, 33>}, {transform_indices = @transform_1, window_bounds = array<i64: 1, 32, 256>}, {transform_indices = @transform_2, window_bounds = array<i64: 1, 33, 256>}, {pipeline_mode = #tpu.pipeline_mode<synchronous>, transform_indices = @transform_3, window_bounds = array<i64: 5, 32>}, {pipeline_mode = #tpu.pipeline_mode<synchronous>, transform_indices = @transform_4, window_bounds = array<i64: 5, 1>}, {pipeline_mode = #tpu.pipeline_mode<synchronous>, transform_indices = @transform_5, window_bounds = array<i64: 32, 4>}, {pipeline_mode = #tpu.pipeline_mode<synchronous>, transform_indices = @transform_6, window_bounds = array<i64: 32, 1>}, {transform_indices = @transform_7, window_bounds = array<i64: 1, 32, 256>}]} {
    %c0 = arith.constant 0 : index
    %c0_0 = arith.constant 0 : index
    %c0_1 = arith.constant 0 : index
    %0 = vector.load %arg1[%c0, %c0_0, %c0_1] : memref<1x256x33xbf16, #tpu.memory_space<vmem>>, vector<1x256x33xbf16>
    %1 = vector.shape_cast %0 : vector<1x256x33xbf16> to vector<256x33xbf16>
    %c0_2 = arith.constant 0 : index
    %c0_3 = arith.constant 0 : index
    %c0_4 = arith.constant 0 : index
    %2 = vector.load %arg3[%c0_2, %c0_3, %c0_4] : memref<1x33x256xbf16, #tpu.memory_space<vmem>>, vector<1x33x256xbf16>
    %3 = vector.shape_cast %2 : vector<1x33x256xbf16> to vector<33x256xbf16>
    %c0_5 = arith.constant 0 : index
    %c0_6 = arith.constant 0 : index
    %c0_7 = arith.constant 0 : index
    %4 = vector.load %arg2[%c0_5, %c0_6, %c0_7] : memref<1x32x256xf32, #tpu.memory_space<vmem>>, vector<1x32x256xf32>
    %5 = vector.shape_cast %4 : vector<1x32x256xf32> to vector<32x256xf32>
    %cst = arith.constant dense<0.000000e+00> : vector<256x256xf32>
    %6 = tpu.matmul %1, %3, %cst {dimension_numbers = #tpu.dot_dimension_numbers<[1], [0], [0], [1], [0, 0, 1, 1], [], []>} : vector<256x33xbf16>, vector<33x256xbf16>, vector<256x256xf32> -> vector<256x256xf32>
    %cst_8 = arith.constant dense<0xFF800000> : vector<256xf32>
    %7 = vector.multi_reduction <maximumf>, %6, %cst_8 [1] : vector<256x256xf32> to vector<256xf32>
    %8 = vector.shape_cast %7 : vector<256xf32> to vector<256x1xf32>
    %9 = vector.broadcast %8 : vector<256x1xf32> to vector<256x256xf32>
    %10 = arith.subf %6, %9 : vector<256x256xf32>
    %11 = math.exp %10 : vector<256x256xf32>
    %c0_9 = arith.constant 0 : index
    %c0_10 = arith.constant 0 : index
    %12 = vector.load %arg4[%c0_9, %c0_10] : memref<5x32xf32, #tpu.memory_space<vmem>>, vector<5x32xf32>
    %cst_11 = arith.constant dense<0.000000e+00> : vector<5x256xf32>
    %13 = tpu.matmul %12, %5, %cst_11 {dimension_numbers = #tpu.dot_dimension_numbers<[1], [0], [0], [1], [0, 0, 1, 1], [], []>} : vector<5x32xf32>, vector<32x256xf32>, vector<5x256xf32> -> vector<5x256xf32>
    %c0_12 = arith.constant 0 : index
    %c0_13 = arith.constant 0 : index
    %14 = vector.load %arg5[%c0_12, %c0_13] : memref<5x1xf32, #tpu.memory_space<vmem>>, vector<5x1xf32>
    %15 = vector.broadcast %14 : vector<5x1xf32> to vector<5x256xf32>
    %16 = arith.addf %13, %15 : vector<5x256xf32>
    %cst_14 = arith.constant dense<0.000000e+00> : vector<256x5xf32>
    %17 = tpu.matmul %11, %16, %cst_14 {dimension_numbers = #tpu.dot_dimension_numbers<[1], [1], [0], [0], [0, 0, 1, 0], [], []>} : vector<256x256xf32>, vector<5x256xf32>, vector<256x5xf32> -> vector<256x5xf32>
    %18 = vector.extract_strided_slice %17 {offsets = [0, 0], sizes = [256, 4], strides = [1, 1]} : vector<256x5xf32> to vector<256x4xf32>
    %19 = vector.extract_strided_slice %17 {offsets = [0, 4], sizes = [256, 1], strides = [1, 1]} : vector<256x5xf32> to vector<256x1xf32>
    %20 = tpu.reciprocal %19 {approx = true} : vector<256x1xf32> -> vector<256x1xf32>
    %21 = vector.broadcast %20 : vector<256x1xf32> to vector<256x4xf32>
    %22 = arith.mulf %18, %21 : vector<256x4xf32>
    %c0_15 = arith.constant 0 : index
    %c0_16 = arith.constant 0 : index
    %23 = vector.load %arg6[%c0_15, %c0_16] : memref<32x4xf32, #tpu.memory_space<vmem>>, vector<32x4xf32>
    %cst_17 = arith.constant dense<0.000000e+00> : vector<32x256xf32>
    %24 = tpu.matmul %23, %22, %cst_17 {dimension_numbers = #tpu.dot_dimension_numbers<[1], [1], [0], [0], [0, 0, 1, 0], [], []>} : vector<32x4xf32>, vector<256x4xf32>, vector<32x256xf32> -> vector<32x256xf32>
    %c0_18 = arith.constant 0 : index
    %c0_19 = arith.constant 0 : index
    %25 = vector.load %arg7[%c0_18, %c0_19] : memref<32x1xf32, #tpu.memory_space<vmem>>, vector<32x1xf32>
    %26 = vector.broadcast %25 : vector<32x1xf32> to vector<32x256xf32>
    %27 = arith.addf %24, %26 : vector<32x256xf32>
    %28 = arith.addf %27, %5 : vector<32x256xf32>
    %c0_20 = arith.constant 0 : index
    %c0_21 = arith.constant 0 : index
    %c0_22 = arith.constant 0 : index
    %29 = vector.load %arg8[%c0_20, %c0_21, %c0_22] : memref<1x32x256xf32, #tpu.memory_space<vmem>>, vector<1x32x256xf32>
    %30 = vector.shape_cast %29 : vector<1x32x256xf32> to vector<32x256xf32>
    %31 = vector.shape_cast %28 : vector<32x256xf32> to vector<1x32x256xf32>
    tpu.vector_store %arg8[%c0_20, %c0_21, %c0_22], %31 {strides = array<i32>} : memref<1x32x256xf32, #tpu.memory_space<vmem>>, vector<1x32x256xf32>,
    return
  }
  func.func @transform_0(%arg0: i32) -> (i32, i32, i32) {
    %c0_i32 = arith.constant 0 : i32
    %c0_i32_0 = arith.constant 0 : i32
    %c0_i32_1 = arith.constant 0 : i32
    return %arg0, %c0_i32, %c0_i32_0 : i32, i32, i32
  }
  func.func @transform_1(%arg0: i32) -> (i32, i32, i32) {
    %c0_i32 = arith.constant 0 : i32
    %c0_i32_0 = arith.constant 0 : i32
    %c0_i32_1 = arith.constant 0 : i32
    return %arg0, %c0_i32, %c0_i32_0 : i32, i32, i32
  }
  func.func @transform_2(%arg0: i32) -> (i32, i32, i32) {
    %c0_i32 = arith.constant 0 : i32
    %c0_i32_0 = arith.constant 0 : i32
    %c0_i32_1 = arith.constant 0 : i32
    return %arg0, %c0_i32, %c0_i32_0 : i32, i32, i32
  }
  func.func @transform_3(%arg0: i32) -> (i32, i32) {
    %c0_i32 = arith.constant 0 : i32
    %c0_i32_0 = arith.constant 0 : i32
    %c0_i32_1 = arith.constant 0 : i32
    return %c0_i32, %c0_i32_0 : i32, i32
  }
  func.func @transform_4(%arg0: i32) -> (i32, i32) {
    %c0_i32 = arith.constant 0 : i32
    %c0_i32_0 = arith.constant 0 : i32
    %c0_i32_1 = arith.constant 0 : i32
    return %c0_i32, %c0_i32_0 : i32, i32
  }
  func.func @transform_5(%arg0: i32) -> (i32, i32) {
    %c0_i32 = arith.constant 0 : i32
    %c0_i32_0 = arith.constant 0 : i32
    %c0_i32_1 = arith.constant 0 : i32
    return %c0_i32, %c0_i32_0 : i32, i32
  }
  func.func @transform_6(%arg0: i32) -> (i32, i32) {
    %c0_i32 = arith.constant 0 : i32
    %c0_i32_0 = arith.constant 0 : i32
    %c0_i32_1 = arith.constant 0 : i32
    return %c0_i32, %c0_i32_0 : i32, i32
  }
  func.func @transform_7(%arg0: i32) -> (i32, i32, i32) {
    %c0_i32 = arith.constant 0 : i32
    %c0_i32_0 = arith.constant 0 : i32
    %c0_i32_1 = arith.constant 0 : i32
    return %arg0, %c0_i32, %c0_i32_0 : i32, i32, i32
  }
}

</mosaic_0001>

<bundles_post_ra>
// kernel: self_attn_forward.1
= control target key start
LH: loop header
LB: loop body
LE: loop exit
PB: predicated region body
PF: predicated region fallthrough
CT: control target
= control target key end

     0   :  { %s2317_s24 = smov 0   ;;  %s2925_s0 = inlined_call_operand.vmem [shape: bf16[4,256,33], index: 0, kind: input, shape index: {}]   ;;  %s2926_s1 = inlined_call_operand.vmem [shape: f32[4,32,256], index: 1, kind: input, shape index: {}]   ;;  %s2927_s2 = inlined_call_operand.vmem [shape: bf16[4,33,256], index: 2, kind: input, shape index: {}]   ;;  %s2928_s3 = inlined_call_operand.vmem [shape: f32[5,32], index: 3, kind: input, shape index: {}]   ;;  %s2929_s4 = inlined_call_operand.vmem [shape: f32[5,1], index: 4, kind: input, shape index: {}]   ;;  %s2930_s5 = inlined_call_operand.vmem [shape: f32[32,4], index: 5, kind: input, shape index: {}]   ;;  %s2931_s6 = inlined_call_operand.vmem [shape: f32[32,1], index: 6, kind: input, shape index: {}]   ;;  %s2932_s7 = inlined_call_operand.vmem [shape: f32[4,32,256], index: 7, kind: output, shape index: {}]  }
   0x1 LB: > { %s1861_s25 = sadd.s32 4294967295, %s2272_s24   ;;  %p1865_p0 = scmp.ge.s32.totalorder %s2272_s24, 1  ;;  %s2272_s24 = sphi %s2317_s24, %s17_s24  }
   0x2   : > { %p257_p1 = scmp.lt.s32.totalorder %s2272_s24, 5 }
   0x4   : > { %p258_p2 = pnand %p1865_p0, %p257_p1 }
   0x6   : > { %261 = sbr.rel (%p258_p2) target bundleno = 1128 (0x468), region = 48 }
   0xb   : > { %p299_p3 = scmp.lt.s32.totalorder %s1861_s25, 3  ;;  %v2933_v0 = vmov 0   ;;  %vm519_vm0 = vcmask 1040384   ;;  %v2275_v11 = vmov 0.0   ;;  %vm470_vm1 = vcmask 269312  }
   0xc   : > { %560 = vmatprep.mubr.bf16.mxu0 %v2933_v0  ;;  %2037 = vset.pattern.permute.xlu0 %v2933_v0  ;;  %v521_v2 = vsel %vm519_vm0, 65535, %v2933_v0  ;;  %v1009_v22 = vld [vmem:[%s2928_s3] sm:$0x1f]  ;;  %vm1016_vm2 = vcmask 261120   ;;  %vm1568_vm3 = vcmask 31744  }
   0xd   : > { %s2982_s25 = smov (!%p299_p3, %s1861_s25), 3  ;;  %1084 = vmatprep.mubr.f32.mxu1 %v2275_v11 }
   0xe   : > { %s1950_s26 = sshll.u32 %s2982_s25, 7  ;;  %s2025_s27 = smul.u32 40, %s2982_s25 }
   0xf   : > { %s2334_s30 = scalar_lea.vmem %s2925_s0, %s1950_s26  ;;  %s1951_s11 = sshll.u32 %s2982_s25, 6 }
  0x10   : > { %s313_s10 = scalar_lea.vmem %s2927_s2, %s2025_s27  ;;  %v2050_v12 = vld [vmem:[%s2334_s30] sm:$0xff]   ;;  %s2347_s14 = scalar_lea.vmem %s2926_s1, %s1951_s11  ;;  %v2051_v18 = vld [vmem:[%s2334_s30 + $0x8] sm:$0xff]   ;;  %v2052_v23 = vld [vmem:[%s2334_s30 + $0x10] sm:$0xff]  }
  0x11   : > { %v356_v1 = vld [vmem:[%s313_s10 + $0x20] sm:$0x11]  ;;  %v2044_v7 = vld [vmem:[%s313_s10 + $0x14] ss:$8 sps:$4 sm:$0xff]   ;;  %v2046_v8 = vld [vmem:[%s313_s10 + $0x10] ss:$8 sps:$4 sm:$0xff]   ;;  %s2904_s18 = scalar_lea.vmem %s2932_s7, %s1951_s11 }
  0x12   : > { %v1894_v3 = vcombine.high %v356_v1, %v356_v1  ;;  %v1893_v4 = vcombine.low %v356_v1, %v356_v1  ;;  %v2047_v9 = vld [vmem:[%s313_s10 + $0x4] ss:$8 sps:$4 sm:$0xff]   ;;  %v2049_v10 = vld [vmem:[%s313_s10] ss:$8 sps:$4 sm:$0xff]   ;;  %v364_v13 = vld [vmem:[%s2347_s14 + $0x38] sm:$0xff] }
  0x13   : > { %v363_v14 = vld [vmem:[%s2347_s14 + $0x30] sm:$0xff]  ;;  %v362_v15 = vld [vmem:[%s2347_s14 + $0x28] sm:$0xff]  ;;  %1044 = vmatprep.subr.mxu1 %v364_v13  ;;  %v361_v16 = vld [vmem:[%s2347_s14 + $0x20] sm:$0xff] }
  0x14   : > { %v526_v5 = vand.u32 %v1894_v3, %v521_v2  ;;  %v523_v6 = vand.u32 %v1893_v4, %v521_v2  ;;  %1045 = vmatpush1.msra.mxu1 %v363_v14  ;;  %v360_v17 = vld [vmem:[%s2347_s14 + $0x18] sm:$0xff]  ;;  %v359_v19 = vld [vmem:[%s2347_s14 + $0x10] sm:$0xff]  ;;  %v358_v20 = vld [vmem:[%s2347_s14 + $0x8] sm:$0xff] }
  0x15   : > { %1046 = vmatprep.subr.mxu1 %v362_v15  ;;  %v357_v21 = vld [vmem:[%s2347_s14] sm:$0xff]  ;;  %v2053_v24 = vld [vmem:[%s2334_s30 + $0x18] sm:$0xff]   ;;  %v2055_v26 = vld [vmem:[%s2334_s30 + $0x28] sm:$0xff]  }
  0x16   : > { %538 = vmatprep.subr.bf16.mxu0 %v526_v5  ;;  %1047 = vmatpush1.msra.mxu1 %v361_v16  ;;  %v2054_v25 = vld [vmem:[%s2334_s30 + $0x20] sm:$0xff]   ;;  %v2056_v27 = vld [vmem:[%s2334_s30 + $0x30] sm:$0xff]   ;;  %v2057_v28 = vld [vmem:[%s2334_s30 + $0x38] sm:$0xff]  }
  0x17   : > { %539 = vmatpush1.bf16.msra.mxu0 %v523_v6  ;;  %1048 = vmatprep.subr.mxu1 %v360_v17  ;;  %v2058_v29 = vld [vmem:[%s2334_s30 + $0x40] sm:$0xff]   ;;  %v2059_v30 = vld [vmem:[%s2334_s30 + $0x48] sm:$0xff]   ;;  %v2060_v31 = vld [vmem:[%s2334_s30 + $0x50] sm:$0xff]  }
  0x18   : > { %540 = vmatprep.subr.bf16.mxu0 %v2044_v7  ;;  %1049 = vmatpush1.msra.mxu1 %v359_v19  ;;  %v2061_v32 = vld [vmem:[%s2334_s30 + $0x58] sm:$0xff]   ;;  %v2062_v33 = vld [vmem:[%s2334_s30 + $0x60] sm:$0xff]   ;;  %v2063_v34 = vld [vmem:[%s2334_s30 + $0x68] sm:$0xff]  }
  0x19   : > { %1050 = vmatprep.subr.mxu1 %v358_v20  ;;  %v2064_v35 = vld [vmem:[%s2334_s30 + $0x70] sm:$0xff]   ;;  %v2065_v36 = vld [vmem:[%s2334_s30 + $0x78] sm:$0xff]   ;;  %v1010_v5 = vld [vmem:[%s2929_s4] sm:$0x1f] }
  0x1a   : > { %1051 = vmatpush1.msra.mxu1 %v357_v21 }
  0x1b   : > { %541 = vmatpush1.bf16.msra.mxu0 %v2046_v8  ;;  %1911 = vmatmul.mubr.msk.f32.vlgmr.msra.gmra.mxu1 %vm1016_vm2, %v1009_v22 }
  0x1c   : > { %542 = vmatprep.subr.bf16.mxu0 %v2047_v9 }
  0x1f   : > { %543 = vmatpush1.bf16.msra.mxu0 %v2049_v10 }
  0x22   : > { %1895 = vmatmul.mubr.msk.bf16.vlgmr.msra.gmra.mxu0 %vm470_vm1, %v2050_v12 }
  0x23   : > { %570 = vmatprep.mubr.bf16.mxu0 %v2933_v0 }
  0x2a   : > { %1896 = vmatmul.mubr.msk.bf16.gmra.mxu0 %vm470_vm1, %v2051_v18 }
  0x2b   : > { %580 = vmatprep.mubr.bf16.mxu0 %v2933_v0 }
  0x32   : > { %1897 = vmatmul.mubr.msk.bf16.gmra.mxu0 %vm470_vm1, %v2052_v23 }
  0x33   : > { %590 = vmatprep.mubr.bf16.mxu0 %v2933_v0 }
  0x3a   : > { %1898 = vmatmul.mubr.msk.bf16.gmra.mxu0 %vm470_vm1, %v2053_v24 }
  0x3b   : > { %600 = vmatprep.mubr.bf16.mxu0 %v2933_v0 }
  0x42   : > { %1899 = vmatmul.mubr.msk.bf16.gmra.mxu0 %vm470_vm1, %v2054_v25 }
  0x43   : > { %610 = vmatprep.mubr.bf16.mxu0 %v2933_v0 }
  0x4a   : > { %1900 = vmatmul.mubr.msk.bf16.gmra.mxu0 %vm470_vm1, %v2055_v26 }
  0x4b   : > { %620 = vmatprep.mubr.bf16.mxu0 %v2933_v0 }
  0x52   : > { %1901 = vmatmul.mubr.msk.bf16.gmra.mxu0 %vm470_vm1, %v2056_v27 }
  0x53   : > { %630 = vmatprep.mubr.bf16.mxu0 %v2933_v0 }
  0x5a   : > { %1902 = vmatmul.mubr.msk.bf16.gmra.mxu0 %vm470_vm1, %v2057_v28 }
  0x5b   : > { %640 = vmatprep.mubr.bf16.mxu0 %v2933_v0 }
  0x62   : > { %1903 = vmatmul.mubr.msk.bf16.gmra.mxu0 %vm470_vm1, %v2058_v29 }
  0x63   : > { %650 = vmatprep.mubr.bf16.mxu0 %v2933_v0 }
  0x6a   : > { %1904 = vmatmul.mubr.msk.bf16.gmra.mxu0 %vm470_vm1, %v2059_v30 }
  0x6b   : > { %660 = vmatprep.mubr.bf16.mxu0 %v2933_v0 }
  0x72   : > { %1905 = vmatmul.mubr.msk.bf16.gmra.mxu0 %vm470_vm1, %v2060_v31 }
  0x73   : > { %670 = vmatprep.mubr.bf16.mxu0 %v2933_v0 }
  0x7a   : > { %1906 = vmatmul.mubr.msk.bf16.gmra.mxu0 %vm470_vm1, %v2061_v32 }
  0x7b   : > { %680 = vmatprep.mubr.bf16.mxu0 %v2933_v0 }
  0x82   : > { %1907 = vmatmul.mubr.msk.bf16.gmra.mxu0 %vm470_vm1, %v2062_v33 }
  0x83   : > { %690 = vmatprep.mubr.bf16.mxu0 %v2933_v0 }
  0x8a   : > { %1908 = vmatmul.mubr.msk.bf16.gmra.mxu0 %vm470_vm1, %v2063_v34 }
  0x8b   : > { %700 = vmatprep.mubr.bf16.mxu0 %v2933_v0 }
  0x92   : > { %1909 = vmatmul.mubr.msk.bf16.gmra.mxu0 %vm470_vm1, %v2064_v35 }
  0x93   : > { %710 = vmatprep.mubr.bf16.mxu0 %v2933_v0 }
  0x9a   : > { %1910 = vmatmul.mubr.msk.bf16.gmra.mxu0 %vm470_vm1, %v2065_v36 }
  0xe2   : > { %v2406_v37 = vpop.f32.mrf.mxu0 }
  0xe4   : > { %v2408_v38 = vpop.f32.mrf.mxu0 }
  0xe5   : > { %v721_v39 = vmax.f32 %v2406_v37, %v2408_v38 }
  0xe6   : > { %v2412_v40 = vpop.f32.mrf.mxu0 }
  0xe7   : > { %722 = vmax.xlane.f32.xlu0 %v721_v39 }
  0xe8   : > { %v2414_v41 = vpop.f32.mrf.mxu0 }
  0xe9   : > { %v724_v42 = vmax.f32 %v2412_v40, %v2414_v41 }
  0xea   : > { %v2418_v43 = vpop.f32.mrf.mxu0 }
  0xeb   : > { %725 = vmax.xlane.f32.xlu0 %v724_v42 }
  0xec   : > { %v2420_v44 = vpop.f32.mrf.mxu0 }
  0xed   : > { %v727_v45 = vmax.f32 %v2418_v43, %v2420_v44 }
  0xee   : > { %v2424_v46 = vpop.f32.mrf.mxu0 }
  0xef   : > { %728 = vmax.xlane.f32.xlu1 %v727_v45 }
  0xf0   : > { %v2426_v47 = vpop.f32.mrf.mxu0 }
  0xf1   : > { %v730_v48 = vmax.f32 %v2424_v46, %v2426_v47 }
  0xf2   : > { %v2430_v49 = vpop.f32.mrf.mxu0 }
  0xf3   : > { %731 = vmax.xlane.f32.xlu1 %v730_v48 }
  0xf4   : > { %v2432_v50 = vpop.f32.mrf.mxu0 }
  0xf5   : > { %v733_v51 = vmax.f32 %v2430_v49, %v2432_v50 }
  0xf6   : > { %v2436_v52 = vpop.f32.mrf.mxu0 }
  0xf7   : > { %734 = vmax.xlane.f32.xlu0 %v733_v51 }
  0xf8   : > { %v2438_v53 = vpop.f32.mrf.mxu0 }
  0xf9   : > { %v736_v54 = vmax.f32 %v2436_v52, %v2438_v53 }
  0xfa   : > { %v2442_v55 = vpop.f32.mrf.mxu0 }
  0xfb   : > { %737 = vmax.xlane.f32.xlu1 %v736_v54 }
  0xfc   : > { %v2444_v56 = vpop.f32.mrf.mxu0 }
  0xfd   : > { %v739_v57 = vmax.f32 %v2442_v55, %v2444_v56 }
  0xfe   : > { %v2448_v58 = vpop.f32.mrf.mxu0 }
  0xff   : > { %740 = vmax.xlane.f32.xlu1 %v739_v57 }
 0x100   : > { %v2450_v59 = vpop.f32.mrf.mxu0 }
 0x101   : > { %v742_v60 = vmax.f32 %v2448_v58, %v2450_v59 }
 0x102   : > { %v2454_v61 = vpop.f32.mrf.mxu0 }
 0x103   : > { %743 = vmax.xlane.f32.xlu1 %v742_v60 }
 0x104   : > { %v2456_v62 = vpop.f32.mrf.mxu0 }
 0x105   : > { %v745_v63 = vmax.f32 %v2454_v61, %v2456_v62 }
 0x106   : > { %v2460_v1 = vpop.f32.mrf.mxu0 }
 0x107   : > { %746 = vmax.xlane.f32.xlu1 %v745_v63 }
 0x108   : > { %v2462_v2 = vpop.f32.mrf.mxu0 }
 0x109   : > { %v748_v3 = vmax.f32 %v2460_v1, %v2462_v2 }
 0x10a   : > { %v2466_v4 = vpop.f32.mrf.mxu0 }
 0x10b   : > { %749 = vmax.xlane.f32.xlu1 %v748_v3 }
 0x10c   : > { %v2471_v6 = vpop.f32.mrf.mxu0 }
 0x10d   : > { %1013 = vperm.xlu0 %2037, %v1010_v5   ;;  %v751_v7 = vmax.f32 %v2466_v4, %v2471_v6 }
 0x10e   : > { %v2475_v8 = vpop.f32.mrf.mxu0 }
 0x10f   : > { %752 = vmax.xlane.f32.xlu1 %v751_v7 }
 0x110   : > { %v2477_v9 = vpop.f32.mrf.mxu0 }
 0x111   : > { %v754_v10 = vmax.f32 %v2475_v8, %v2477_v9 }
 0x112   : > { %v2481_v11 = vpop.f32.mrf.mxu0 }
 0x113   : > { %755 = vmax.xlane.f32.xlu1 %v754_v10 }
 0x114   : > { %v2483_v12 = vpop.f32.mrf.mxu0 }
 0x115   : > { %v757_v13 = vmax.f32 %v2481_v11, %v2483_v12 }
 0x116   : > { %v2487_v14 = vpop.f32.mrf.mxu0 }
 0x117   : > { %758 = vmax.xlane.f32.xlu1 %v757_v13 }
 0x118   : > { %v2489_v15 = vpop.f32.mrf.mxu0 }
 0x119   : > { %v760_v16 = vmax.f32 %v2487_v14, %v2489_v15 }
 0x11a   : > { %v2493_v17 = vpop.f32.mrf.mxu0 }
 0x11b   : > { %761 = vmax.xlane.f32.xlu1 %v760_v16 }
 0x11c   : > { %v2495_v18 = vpop.f32.mrf.mxu0 }
 0x11d   : > { %v763_v19 = vmax.f32 %v2493_v17, %v2495_v18 }
 0x11e   : > { %v2499_v20 = vpop.f32.mrf.mxu0 }
 0x11f   : > { %764 = vmax.xlane.f32.xlu1 %v763_v19 }
 0x120   : > { %v2501_v21 = vpop.f32.mrf.mxu0 }
 0x121   : > { %v766_v22 = vmax.f32 %v2499_v20, %v2501_v21 }
 0x122   : > { %v2505_v23 = vpop.f32.mrf.mxu0 }
 0x123   : > { %767 = vmax.xlane.f32.xlu1 %v766_v22 }
 0x124   : > { %v2507_v24 = vpop.f32.mrf.mxu0 }
 0x125   : > { %v769_v25 = vmax.f32 %v2505_v23, %v2507_v24 }
 0x126   : > { %v2511_v26 = vpop.f32.mrf.mxu0 }
 0x127   : > { %770 = vmax.xlane.f32.xlu1 %v769_v25 }
 0x128   : > { %v2513_v27 = vpop.f32.mrf.mxu0 }
 0x129   : > { %v772_v28 = vmax.f32 %v2511_v26, %v2513_v27 }
 0x12a   : > { %v2517_v29 = vpop.f32.mrf.mxu0 }
 0x12c   : > { %773 = vmax.xlane.f32.xlu0 %v772_v28  ;;  %v2519_v30 = vpop.f32.mrf.mxu0 }
 0x12d   : > { %v775_v31 = vmax.f32 %v2517_v29, %v2519_v30 }
 0x12e   : > { %v2523_v32 = vpop.f32.mrf.mxu0 }
 0x12f   : > { %776 = vmax.xlane.f32.xlu1 %v775_v31 }
 0x130   : > { %v2525_v33 = vpop.f32.mrf.mxu0 }
 0x131   : > { %v778_v34 = vmax.f32 %v2523_v32, %v2525_v33 }
 0x132   : > { %v2529_v35 = vpop.f32.mrf.mxu0 }
 0x133   : > { %779 = vmax.xlane.f32.xlu1 %v778_v34 }
 0x134   : > { %v2531_v36 = vpop.f32.mrf.mxu0 }
 0x135   : > { %v781_v39 = vmax.f32 %v2529_v35, %v2531_v36 }
 0x136   : > { %v2535_v42 = vpop.f32.mrf.mxu0 }
 0x137   : > { %782 = vmax.xlane.f32.xlu1 %v781_v39 }
 0x138   : > { %v2537_v45 = vpop.f32.mrf.mxu0 }
 0x139   : > { %v784_v48 = vmax.f32 %v2535_v42, %v2537_v45 }
 0x13a   : > { %v2541_v51 = vpop.f32.mrf.mxu0 }
 0x13b   : > { %785 = vmax.xlane.f32.xlu1 %v784_v48 }
 0x13c   : > { %v2543_v54 = vpop.f32.mrf.mxu0 }
 0x13d   : > { %v787_v57 = vmax.f32 %v2541_v51, %v2543_v54 }
 0x13e   : > { %v2547_v60 = vpop.f32.mrf.mxu0 }
 0x13f   : > { %788 = vmax.xlane.f32.xlu1 %v787_v57 }
 0x140   : > { %v2549_v63 = vpop.f32.mrf.mxu0 }
 0x141   : > { %v790_v3 = vmax.f32 %v2547_v60, %v2549_v63 }
 0x142   : > { %v2553_v5 = vpop.f32.mrf.mxu0 }
 0x143   : > { %2950 = vst [vmem:[#allocation2_spill] sm:$0xff] %v2553_v5  ;;  %791 = vmax.xlane.f32.xlu1 %v790_v3 }
 0x144   : > { %v2555_v7 = vpop.f32.mrf.mxu0 }
 0x145   : > { %v793_v10 = vmax.f32 %v2553_v5, %v2555_v7 }
 0x146   : > { %v2559_v13 = vpop.f32.mrf.mxu0 }
 0x147   : > { %2951 = vst [vmem:[#allocation3_spill] sm:$0xff] %v2559_v13  ;;  %794 = vmax.xlane.f32.xlu1 %v793_v10 }
 0x148   : > { %v2561_v16 = vpop.f32.mrf.mxu0 }
 0x149   : > { %2952 = vst [vmem:[#allocation4_spill] sm:$0xff] %v2561_v16  ;;  %v796_v19 = vmax.f32 %v2559_v13, %v2561_v16 }
 0x14a   : > { %v2565_v22 = vpop.f32.mrf.mxu0 }
 0x14b   : > { %2953 = vst [vmem:[#allocation5_spill] sm:$0xff] %v2565_v22  ;;  %797 = vmax.xlane.f32.xlu1 %v796_v19 }
 0x14c   : > { %v2567_v25 = vpop.f32.mrf.mxu0 }
 0x14d   : > { %2954 = vst [vmem:[#allocation6_spill] sm:$0xff] %v2567_v25  ;;  %v799_v28 = vmax.f32 %v2565_v22, %v2567_v25 }
 0x14e   : > { %v2571_v31 = vpop.f32.mrf.mxu0 }
 0x14f   : > { %2955 = vst [vmem:[#allocation7_spill] sm:$0xff] %v2571_v31  ;;  %800 = vmax.xlane.f32.xlu0 %v799_v28 }
 0x150   : > { %v2573_v34 = vpop.f32.mrf.mxu0 }
 0x151   : > { %2956 = vst [vmem:[#allocation8_spill] sm:$0xff] %v2573_v34  ;;  %v802_v39 = vmax.f32 %v2571_v31, %v2573_v34 }
 0x152   : > { %v2577_v48 = vpop.f32.mrf.mxu0 }
 0x153   : > { %2957 = vst [vmem:[#allocation9_spill] sm:$0xff] %v2577_v48  ;;  %803 = vmax.xlane.f32.xlu1 %v802_v39 }
 0x154   : > { %v2579_v57 = vpop.f32.mrf.mxu0 }
 0x155   : > { %2958 = vst [vmem:[#allocation10_spill] sm:$0xff] %v2579_v57  ;;  %v805_v3 = vmax.f32 %v2577_v48, %v2579_v57 }
 0x156   : > { %v2583_v10 = vpop.f32.mrf.mxu0 }
 0x157   : > { %2959 = vst [vmem:[#allocation11_spill] sm:$0xff] %v2583_v10  ;;  %806 = vmax.xlane.f32.xlu0 %v805_v3 }
 0x158   : > { %v2585_v19 = vpop.f32.mrf.mxu0 }
 0x159   : > { %2960 = vst [vmem:[#allocation12_spill] sm:$0xff] %v2585_v19  ;;  %v808_v28 = vmax.f32 %v2583_v10, %v2585_v19 }
 0x15a   : > { %v2589_v0 = vpop.f32.mrf.mxu0 }
 0x15b   : > { %2961 = vst [vmem:[#allocation13_spill] sm:$0xff] %v2589_v0  ;;  %809 = vmax.xlane.f32.xlu1 %v808_v28 }
 0x15c   : > { %v2591_v31 = vpop.f32.mrf.mxu0 }
 0x15d   : > { %2962 = vst [vmem:[#allocation14_spill] sm:$0xff] %v2591_v31  ;;  %v811_v39 = vmax.f32 %v2589_v0, %v2591_v31 }
 0x15e   : > { %v2595_v34 = vpop.f32.mrf.mxu0 }
 0x15f   : > { %2963 = vst [vmem:[#allocation15_spill] sm:$0xff] %v2595_v34  ;;  %812 = vmax.xlane.f32.xlu0 %v811_v39 }
 0x160   : > { %v2597_v48 = vpop.f32.mrf.mxu0 }
 0x161   : > { %2964 = vst [vmem:[#allocation16_spill] sm:$0xff] %v2597_v48  ;;  %v814_v3 = vmax.f32 %v2595_v34, %v2597_v48 }
 0x163   : > { %815 = vmax.xlane.f32.xlu1 %v814_v3 }
 0x170   : > { %v723_v57 = vpop.xlane.xlu0 %722 }
 0x171   : > { %v818_v10 = vsub.f32 %v2408_v38, %v723_v57  ;;  %v817_v22 = vsub.f32 %v2406_v37, %v723_v57  ;;  %v1086_v57 = vpop.f32.mrf.mxu1 }
 0x173   : > { %v883_v19 = vmul.f32 1.442695, %v818_v10  ;;  %v881_v31 = vmul.f32 1.442695, %v817_v22 }
 0x174   : > { %v726_v28 = vpop.xlane.xlu0 %725 }
 0x175   : > { %2066 = vpow2.f32 %v883_v19  ;;  %v820_v0 = vsub.f32 %v2414_v41, %v726_v28  ;;  %v819_v39 = vsub.f32 %v2412_v40, %v726_v28 }
 0x176   : > { %2068 = vpow2.f32 %v881_v31 }
 0x177   : > { %v887_v13 = vmul.f32 1.442695, %v820_v0  ;;  %v885_v34 = vmul.f32 1.442695, %v819_v39 }
 0x178   : > { %v729_v25 = vpop.xlane.xlu1 %728 }
 0x179   : > { %v822_v16 = vsub.f32 %v2420_v44, %v729_v25  ;;  %v821_v3 = vsub.f32 %v2418_v43, %v729_v25  ;;  %2070 = vpow2.f32 %v887_v13  ;;  %v1088_v43 = vpop.f32.mrf.mxu1 }
 0x17a   : > { %2072 = vpow2.f32 %v885_v34 }
 0x17b   : > { %v891_v38 = vmul.f32 1.442695, %v822_v16  ;;  %v889_v48 = vmul.f32 1.442695, %v821_v3 }
 0x17c   : > { %v732_v5 = vpop.xlane.xlu1 %731 }
 0x17d   : > { %v824_v10 = vsub.f32 %v2426_v47, %v732_v5  ;;  %v823_v0 = vsub.f32 %v2424_v46, %v732_v5  ;;  %2074 = vpow2.f32 %v891_v38 }
 0x17e   : > { %2076 = vpow2.f32 %v889_v48 }
 0x17f   : > { %v895_v40 = vmul.f32 1.442695, %v824_v10  ;;  %v893_v16 = vmul.f32 1.442695, %v823_v0 }
 0x180   : > { %v735_v37 = vpop.xlane.xlu0 %734 }
 0x181   : > { %v826_v44 = vsub.f32 %v2432_v50, %v735_v37  ;;  %v825_v47 = vsub.f32 %v2430_v49, %v735_v37  ;;  %2078 = vpow2.f32 %v895_v40 }
 0x182   : > { %v2067_v19 = vpop.eup %2066  ;;  %2080 = vpow2.f32 %v893_v16 }
 0x183   : > { %1155 = vmatprep.mubr.f32.mxu1 %v2067_v19  ;;  %v899_v28 = vmul.f32 1.442695, %v826_v44  ;;  %v897_v5 = vmul.f32 1.442695, %v825_v47  ;;  %v2069_v34 = vpop.eup %2068 }
 0x184   : > { %v738_v41 = vpop.xlane.xlu1 %737 }
 0x185   : > { %v828_v39 = vsub.f32 %v2438_v53, %v738_v41  ;;  %v827_v50 = vsub.f32 %v2436_v52, %v738_v41  ;;  %2082 = vpow2.f32 %v899_v28 }
 0x186   : > { %v2071_v38 = vpop.eup %2070  ;;  %2084 = vpow2.f32 %v897_v5 }
 0x187   : > { %v903_v48 = vmul.f32 1.442695, %v828_v39  ;;  %v901_v10 = vmul.f32 1.442695, %v827_v50  ;;  %v2073_v19 = vpop.eup %2072 }
 0x188   : > { %v1014_v22 = vpop.permute.xlu0 %1013  ;;  %v741_v13 = vpop.xlane.xlu1 %740 }
 0x189   : > { %v1087_v25 = vadd.f32 %v1086_v57, %v1014_v22  ;;  %v1089_v31 = vadd.f32 %v1088_v43, %v1014_v22  ;;  %v830_v3 = vsub.f32 %v2444_v56, %v741_v13  ;;  %v829_v53 = vsub.f32 %v2442_v55, %v741_v13 }
 0x18a   : > { %2086 = vpow2.f32 %v903_v48  ;;  %v2075_v0 = vpop.eup %2074 }
 0x18b   : > { %1121 = vmatprep.subr.mxu1 %v1089_v31  ;;  %v907_v37 = vmul.f32 1.442695, %v830_v3  ;;  %v2077_v41 = vpop.eup %2076  ;;  %2088 = vpow2.f32 %v901_v10  ;;  %v905_v56 = vmul.f32 1.442695, %v829_v53 }
 0x18c   : > { %1122 = vmatpush1.xpose.msra.mxu1 %v1087_v25  ;;  %v744_v46 = vpop.xlane.xlu1 %743 }
 0x18d   : > { %v832_v57 = vsub.f32 %v2450_v59, %v744_v46  ;;  %v831_v40 = vsub.f32 %v2448_v58, %v744_v46  ;;  %2090 = vpow2.f32 %v907_v37 }
 0x18e   : > { %v2079_v22 = vpop.eup %2078  ;;  %2092 = vpow2.f32 %v905_v56 }
 0x18f   : > { %1156 = vmatmul.mubr.f32.vlgmr.msra.gmra.mxu1 %v2069_v34  ;;  %v911_v44 = vmul.f32 1.442695, %v832_v57  ;;  %v909_v13 = vmul.f32 1.442695, %v831_v40  ;;  %v2081_v16 = vpop.eup %2080 }
 0x190   : > { %1160 = vmatprep.mubr.f32.mxu1 %v2071_v38  ;;  %v747_v49 = vpop.xlane.xlu1 %746 }
 0x191   : > { %v834_v43 = vsub.f32 %v2456_v62, %v747_v49  ;;  %v833_v59 = vsub.f32 %v2454_v61, %v747_v49  ;;  %2094 = vpow2.f32 %v911_v44 }
 0x192   : > { %v2083_v31 = vpop.eup %2082  ;;  %2096 = vpow2.f32 %v909_v13 }
 0x193   : > { %1161 = vmatmul.mubr.f32.gmra.mxu1 %v2073_v19  ;;  %v915_v47 = vmul.f32 1.442695, %v834_v43  ;;  %v913_v28 = vmul.f32 1.442695, %v833_v59  ;;  %v2085_v39 = vpop.eup %2084 }
 0x194   : > { %1165 = vmatprep.mubr.f32.mxu1 %v2075_v0  ;;  %v750_v52 = vpop.xlane.xlu1 %749 }
 0x195   : > { %v836_v25 = vsub.f32 %v2462_v2, %v750_v52  ;;  %v835_v62 = vsub.f32 %v2460_v1, %v750_v52  ;;  %2098 = vpow2.f32 %v915_v47 }
 0x196   : > { %2100 = vpow2.f32 %v913_v28 }
 0x197   : > { %1166 = vmatmul.mubr.f32.gmra.mxu1 %v2077_v41  ;;  %v919_v46 = vmul.f32 1.442695, %v836_v25  ;;  %v2087_v50 = vpop.eup %2086  ;;  %v917_v34 = vmul.f32 1.442695, %v835_v62 }
 0x198   : > { %1170 = vmatprep.mubr.f32.mxu1 %v2079_v22  ;;  %v753_v55 = vpop.xlane.xlu1 %752  ;;  %v2089_v48 = vpop.eup %2088 }
 0x199   : > { %v838_v5 = vsub.f32 %v2471_v6, %v753_v55  ;;  %v837_v2 = vsub.f32 %v2466_v4, %v753_v55  ;;  %2102 = vpow2.f32 %v919_v46 }
 0x19a   : > { %v2091_v49 = vpop.eup %2090  ;;  %2104 = vpow2.f32 %v917_v34 }
 0x19b   : > { %1171 = vmatmul.mubr.f32.gmra.mxu1 %v2081_v16  ;;  %v923_v3 = vmul.f32 1.442695, %v838_v5  ;;  %v921_v10 = vmul.f32 1.442695, %v837_v2  ;;  %v2093_v53 = vpop.eup %2092 }
 0x19c   : > { %1175 = vmatprep.mubr.f32.mxu1 %v2083_v31  ;;  %v756_v58 = vpop.xlane.xlu1 %755 }
 0x19d   : > { %v840_v38 = vsub.f32 %v2477_v9, %v756_v58  ;;  %v839_v6 = vsub.f32 %v2475_v8, %v756_v58  ;;  %2106 = vpow2.f32 %v923_v3 }
 0x19e   : > { %v2095_v57 = vpop.eup %2094  ;;  %2108 = vpow2.f32 %v921_v10 }
 0x19f   : > { %1176 = vmatmul.mubr.f32.gmra.mxu1 %v2085_v39  ;;  %v927_v19 = vmul.f32 1.442695, %v840_v38  ;;  %v925_v0 = vmul.f32 1.442695, %v839_v6  ;;  %v2097_v52 = vpop.eup %2096 }
 0x1a0   : > { %1180 = vmatprep.mubr.f32.mxu1 %v2087_v50  ;;  %v759_v61 = vpop.xlane.xlu1 %758 }
 0x1a1   : > { %v842_v37 = vsub.f32 %v2483_v12, %v759_v61  ;;  %v841_v9 = vsub.f32 %v2481_v11, %v759_v61  ;;  %2110 = vpow2.f32 %v927_v19 }
 0x1a2   : > { %v2099_v40 = vpop.eup %2098  ;;  %2112 = vpow2.f32 %v925_v0 }
 0x1a3   : > { %1181 = vmatmul.mubr.f32.gmra.mxu1 %v2089_v48  ;;  %v931_v41 = vmul.f32 1.442695, %v842_v37  ;;  %v929_v8 = vmul.f32 1.442695, %v841_v9  ;;  %v2101_v43 = vpop.eup %2100 }
 0x1a4   : > { %1185 = vmatprep.mubr.f32.mxu1 %v2091_v49  ;;  %v762_v1 = vpop.xlane.xlu1 %761 }
 0x1a5   : > { %v844_v56 = vsub.f32 %v2489_v15, %v762_v1  ;;  %v843_v12 = vsub.f32 %v2487_v14, %v762_v1  ;;  %2114 = vpow2.f32 %v931_v41 }
 0x1a6   : > { %v2103_v13 = vpop.eup %2102  ;;  %2116 = vpow2.f32 %v929_v8 }
 0x1a7   : > { %1186 = vmatmul.mubr.f32.gmra.mxu1 %v2093_v53  ;;  %v935_v22 = vmul.f32 1.442695, %v844_v56  ;;  %v933_v11 = vmul.f32 1.442695, %v843_v12  ;;  %v2105_v59 = vpop.eup %2104 }
 0x1a8   : > { %1190 = vmatprep.mubr.f32.mxu1 %v2095_v57  ;;  %v765_v4 = vpop.xlane.xlu1 %764 }
 0x1a9   : > { %v846_v55 = vsub.f32 %v2495_v18, %v765_v4  ;;  %v845_v15 = vsub.f32 %v2493_v17, %v765_v4  ;;  %2118 = vpow2.f32 %v935_v22 }
 0x1aa   : > { %v2107_v25 = vpop.eup %2106  ;;  %2120 = vpow2.f32 %v933_v11 }
 0x1ab   : > { %1191 = vmatmul.mubr.f32.gmra.mxu1 %v2097_v52  ;;  %v939_v16 = vmul.f32 1.442695, %v846_v55  ;;  %v937_v31 = vmul.f32 1.442695, %v845_v15  ;;  %v2109_v58 = vpop.eup %2108 }
 0x1ac   : > { %1195 = vmatprep.mubr.f32.mxu1 %v2099_v40  ;;  %v768_v44 = vpop.xlane.xlu1 %767 }
 0x1ad   : > { %v848_v47 = vsub.f32 %v2501_v21, %v768_v44  ;;  %v847_v18 = vsub.f32 %v2499_v20, %v768_v44  ;;  %2122 = vpow2.f32 %v939_v16 }
 0x1ae   : > { %v2111_v39 = vpop.eup %2110  ;;  %2124 = vpow2.f32 %v937_v31 }
 0x1af   : > { %1196 = vmatmul.mubr.f32.gmra.mxu1 %v2101_v43  ;;  %v943_v28 = vmul.f32 1.442695, %v848_v47  ;;  %v941_v21 = vmul.f32 1.442695, %v847_v18  ;;  %v2113_v50 = vpop.eup %2112 }
 0x1b0   : > { %1200 = vmatprep.mubr.f32.mxu1 %v2103_v13  ;;  %v771_v14 = vpop.xlane.xlu1 %770 }
 0x1b1   : > { %v850_v62 = vsub.f32 %v2507_v24, %v771_v14  ;;  %v849_v5 = vsub.f32 %v2505_v23, %v771_v14  ;;  %2126 = vpow2.f32 %v943_v28  ;;  %v2965_v28 = vld [vmem:[#allocation2_spill] sm:$0xff] }
 0x1b2   : > { %v2115_v20 = vpop.eup %2114  ;;  %2128 = vpow2.f32 %v941_v21 }
 0x1b3   : > { %1201 = vmatmul.mubr.f32.gmra.mxu1 %v2105_v59  ;;  %v947_v61 = vmul.f32 1.442695, %v850_v62  ;;  %v945_v24 = vmul.f32 1.442695, %v849_v5  ;;  %v2117_v3 = vpop.eup %2116 }
 0x1b4   : > { %1205 = vmatprep.mubr.f32.mxu1 %v2107_v25 }
 0x1b5   : > { %v774_v17 = vpop.xlane.xlu0 %773  ;;  %2130 = vpow2.f32 %v947_v61 }
 0x1b6   : > { %v852_v34 = vsub.f32 %v2513_v27, %v774_v17  ;;  %v851_v48 = vsub.f32 %v2511_v26, %v774_v17  ;;  %v2119_v1 = vpop.eup %2118  ;;  %2132 = vpow2.f32 %v945_v24  ;;  %v2966_v17 = vld [vmem:[#allocation4_spill] sm:$0xff] }
 0x1b7   : > { %1206 = vmatmul.mubr.f32.gmra.mxu1 %v2109_v58  ;;  %v2121_v6 = vpop.eup %2120 }
 0x1b8   : > { %1210 = vmatprep.mubr.f32.mxu1 %v2111_v39  ;;  %v777_v46 = vpop.xlane.xlu1 %776  ;;  %v951_v38 = vmul.f32 1.442695, %v852_v34  ;;  %v949_v10 = vmul.f32 1.442695, %v851_v48 }
 0x1b9   : > { %v854_v49 = vsub.f32 %v2519_v30, %v777_v46  ;;  %v853_v27 = vsub.f32 %v2517_v29, %v777_v46 }
 0x1ba   : > { %2134 = vpow2.f32 %v951_v38  ;;  %v2123_v37 = vpop.eup %2122  ;;  %v2969_v38 = vld [vmem:[#allocation5_spill] sm:$0xff] }
 0x1bb   : > { %1211 = vmatmul.mubr.f32.gmra.mxu1 %v2113_v50  ;;  %v955_v53 = vmul.f32 1.442695, %v854_v49  ;;  %2136 = vpow2.f32 %v949_v10  ;;  %v953_v57 = vmul.f32 1.442695, %v853_v27  ;;  %v2125_v4 = vpop.eup %2124  ;;  %v2970_v10 = vld [vmem:[#allocation8_spill] sm:$0xff] }
 0x1bc   : > { %1215 = vmatprep.mubr.f32.mxu1 %v2115_v20  ;;  %v780_v2 = vpop.xlane.xlu1 %779  ;;  %v2968_v20 = vld [vmem:[#allocation6_spill] sm:$0xff] }
 0x1bd   : > { %v856_v19 = vsub.f32 %v2525_v33, %v780_v2  ;;  %v855_v30 = vsub.f32 %v2523_v32, %v780_v2  ;;  %2138 = vpow2.f32 %v955_v53 }
 0x1be   : > { %v2127_v52 = vpop.eup %2126  ;;  %2140 = vpow2.f32 %v953_v57 }
 0x1bf   : > { %1216 = vmatmul.mubr.f32.gmra.mxu1 %v2117_v3  ;;  %v959_v0 = vmul.f32 1.442695, %v856_v19  ;;  %v957_v41 = vmul.f32 1.442695, %v855_v30  ;;  %v2129_v56 = vpop.eup %2128 }
 0x1c0   : > { %1220 = vmatprep.mubr.f32.mxu1 %v2119_v1  ;;  %v783_v23 = vpop.xlane.xlu1 %782 }
 0x1c1   : > { %v858_v9 = vsub.f32 %v2531_v36, %v783_v23  ;;  %v857_v33 = vsub.f32 %v2529_v35, %v783_v23  ;;  %2142 = vpow2.f32 %v959_v0 }
 0x1c2   : > { %v2131_v12 = vpop.eup %2130  ;;  %2144 = vpow2.f32 %v957_v41  ;;  %v2973_v41 = vld [vmem:[#allocation9_spill] sm:$0xff] }
 0x1c3   : > { %1221 = vmatmul.mubr.f32.gmra.mxu1 %v2121_v6  ;;  %v963_v40 = vmul.f32 1.442695, %v858_v9  ;;  %v961_v44 = vmul.f32 1.442695, %v857_v33  ;;  %v2133_v43 = vpop.eup %2132 }
 0x1c4   : > { %1225 = vmatprep.mubr.f32.mxu1 %v2123_v37  ;;  %v786_v26 = vpop.xlane.xlu1 %785  ;;  %v2971_v37 = vld [vmem:[#allocation7_spill] sm:$0xff] }
 0x1c5   : > { %v860_v8 = vsub.f32 %v2537_v45, %v786_v26  ;;  %v859_v36 = vsub.f32 %v2535_v42, %v786_v26  ;;  %2146 = vpow2.f32 %v963_v40 }
 0x1c6   : > { %2148 = vpow2.f32 %v961_v44 }
 0x1c7   : > { %1226 = vmatmul.mubr.f32.gmra.mxu1 %v2125_v4  ;;  %v967_v22 = vmul.f32 1.442695, %v860_v8  ;;  %v2135_v13 = vpop.eup %2134  ;;  %v965_v35 = vmul.f32 1.442695, %v859_v36  ;;  %v2972_v4 = vld [vmem:[#allocation10_spill] sm:$0xff]  ;;  %v2974_v8 = vld [vmem:[#allocation12_spill] sm:$0xff] }
 0x1c8   : > { %1230 = vmatprep.mubr.f32.mxu1 %v2127_v52  ;;  %v789_v29 = vpop.xlane.xlu1 %788  ;;  %v2137_v15 = vpop.eup %2136 }
 0x1c9   : > { %v862_v55 = vsub.f32 %v2543_v54, %v789_v29  ;;  %v861_v45 = vsub.f32 %v2541_v51, %v789_v29  ;;  %2150 = vpow2.f32 %v967_v22 }
 0x1ca   : > { %v2139_v47 = vpop.eup %2138  ;;  %2152 = vpow2.f32 %v965_v35  ;;  %v2976_v35 = vld [vmem:[#allocation14_spill] sm:$0xff] }
 0x1cb   : > { %1231 = vmatmul.mubr.f32.gmra.mxu1 %v2129_v56  ;;  %v971_v59 = vmul.f32 1.442695, %v862_v55  ;;  %v969_v42 = vmul.f32 1.442695, %v861_v45  ;;  %v2141_v25 = vpop.eup %2140 }
 0x1cc   : > { %1235 = vmatprep.mubr.f32.mxu1 %v2131_v12  ;;  %v792_v32 = vpop.xlane.xlu1 %791 }
 0x1cd   : > { %v864_v16 = vsub.f32 %v2549_v63, %v792_v32  ;;  %v863_v54 = vsub.f32 %v2547_v60, %v792_v32  ;;  %2154 = vpow2.f32 %v971_v59 }
 0x1ce   : > { %v2143_v18 = vpop.eup %2142  ;;  %2156 = vpow2.f32 %v969_v42 }
 0x1cf   : > { %1236 = vmatmul.mubr.f32.gmra.mxu1 %v2133_v43  ;;  %v975_v14 = vmul.f32 1.442695, %v864_v16  ;;  %v973_v58 = vmul.f32 1.442695, %v863_v54  ;;  %v2145_v62 = vpop.eup %2144  ;;  %v2975_v43 = vld [vmem:[#allocation11_spill] sm:$0xff]  ;;  %v2977_v16 = vld [vmem:[#allocation13_spill] sm:$0xff] }
 0x1d0   : > { %1240 = vmatprep.mubr.f32.mxu1 %v2135_v13  ;;  %v795_v11 = vpop.xlane.xlu1 %794 }
 0x1d1   : > { %v866_v31 = vsub.f32 %v2555_v7, %v795_v11  ;;  %v865_v63 = vsub.f32 %v2965_v28, %v795_v11  ;;  %2158 = vpow2.f32 %v975_v14  ;;  %v2967_v7 = vld [vmem:[#allocation3_spill] sm:$0xff] }
 0x1d2   : > { %v2147_v21 = vpop.eup %2146  ;;  %2160 = vpow2.f32 %v973_v58 }
 0x1d3   : > { %1241 = vmatmul.mubr.f32.gmra.mxu1 %v2137_v15  ;;  %v979_v39 = vmul.f32 1.442695, %v866_v31  ;;  %v977_v5 = vmul.f32 1.442695, %v865_v63  ;;  %v2149_v61 = vpop.eup %2148 }
 0x1d4   : > { %1245 = vmatprep.mubr.f32.mxu1 %v2139_v47  ;;  %v798_v51 = vpop.xlane.xlu1 %797 }
 0x1d5   : > { %v868_v46 = vsub.f32 %v2966_v17, %v798_v51  ;;  %v867_v50 = vsub.f32 %v2967_v7, %v798_v51  ;;  %2162 = vpow2.f32 %v979_v39  ;;  %v2979_v51 = vld [vmem:[#allocation15_spill] sm:$0xff] }
 0x1d6   : > { %v2151_v24 = vpop.eup %2150  ;;  %2164 = vpow2.f32 %v977_v5 }
 0x1d7   : > { %1246 = vmatmul.mubr.f32.gmra.mxu1 %v2141_v25  ;;  %v983_v34 = vmul.f32 1.442695, %v868_v46  ;;  %v981_v3 = vmul.f32 1.442695, %v867_v50  ;;  %v2153_v1 = vpop.eup %2152  ;;  %v2978_v25 = vld [vmem:[#allocation16_spill] sm:$0xff] }
 0x1d8   : > { %1250 = vmatprep.mubr.f32.mxu1 %v2143_v18  ;;  %v801_v60 = vpop.xlane.xlu0 %800 }
 0x1d9   : > { %v870_v2 = vsub.f32 %v2968_v20, %v801_v60  ;;  %v869_v49 = vsub.f32 %v2969_v38, %v801_v60  ;;  %2166 = vpow2.f32 %v983_v34  ;;  %v2276_v20 = vmov 4  }
 0x1da   : > { %v2155_v6 = vpop.eup %2154  ;;  %2168 = vpow2.f32 %v981_v3  ;;  %2039 = vset.pattern.permute.xlu1 %v2276_v20  ;;  %2038 = vset.pattern.permute.xlu0 %v2276_v20 }
 0x1db   : > { %1251 = vmatmul.mubr.f32.gmra.mxu1 %v2145_v62  ;;  %v987_v23 = vmul.f32 1.442695, %v870_v2  ;;  %v985_v19 = vmul.f32 1.442695, %v869_v49  ;;  %v2157_v57 = vpop.eup %2156 }
 0x1dc   : > { %1255 = vmatprep.mubr.f32.mxu1 %v2147_v21  ;;  %v804_v48 = vpop.xlane.xlu1 %803 }
 0x1dd   : > { %v872_v27 = vsub.f32 %v2970_v10, %v804_v48  ;;  %v871_v26 = vsub.f32 %v2971_v37, %v804_v48  ;;  %2170 = vpow2.f32 %v987_v23 }
 0x1de   : > { %v2159_v9 = vpop.eup %2158  ;;  %2172 = vpow2.f32 %v985_v19 }
 0x1df   : > { %1256 = vmatmul.mubr.f32.gmra.mxu1 %v2149_v61  ;;  %v991_v30 = vmul.f32 1.442695, %v872_v27  ;;  %v989_v29 = vmul.f32 1.442695, %v871_v26  ;;  %v2161_v56 = vpop.eup %2160 }
 0x1e0   : > { %1260 = vmatprep.mubr.f32.mxu1 %v2151_v24  ;;  %v807_v53 = vpop.xlane.xlu0 %806 }
 0x1e1   : > { %v874_v0 = vsub.f32 %v2972_v4, %v807_v53  ;;  %v873_v33 = vsub.f32 %v2973_v41, %v807_v53  ;;  %2174 = vpow2.f32 %v991_v30 }
 0x1e2   : > { %v2163_v32 = vpop.eup %2162  ;;  %2176 = vpow2.f32 %v989_v29 }
 0x1e3   : > { %1261 = vmatmul.mubr.f32.gmra.mxu1 %v2153_v1  ;;  %v995_v40 = vmul.f32 1.442695, %v874_v0  ;;  %v993_v36 = vmul.f32 1.442695, %v873_v33  ;;  %v2165_v55 = vpop.eup %2164 }
 0x1e4   : > { %1265 = vmatprep.mubr.f32.mxu1 %v2155_v6  ;;  %v810_v52 = vpop.xlane.xlu1 %809 }
 0x1e5   : > { %v876_v12 = vsub.f32 %v2974_v8, %v810_v52  ;;  %v875_v22 = vsub.f32 %v2975_v43, %v810_v52  ;;  %2178 = vpow2.f32 %v995_v40 }
 0x1e6   : > { %v2167_v11 = vpop.eup %2166  ;;  %2180 = vpow2.f32 %v993_v36 }
 0x1e7   : > { %1266 = vmatmul.mubr.f32.gmra.mxu1 %v2157_v57  ;;  %v999_v13 = vmul.f32 1.442695, %v876_v12  ;;  %v997_v59 = vmul.f32 1.442695, %v875_v22  ;;  %v2169_v42 = vpop.eup %2168 }
 0x1e8   : > { %1270 = vmatprep.mubr.f32.mxu1 %v2159_v9  ;;  %v813_v44 = vpop.xlane.xlu0 %812 }
 0x1e9   : > { %v878_v45 = vsub.f32 %v2976_v35, %v813_v44  ;;  %v877_v47 = vsub.f32 %v2977_v16, %v813_v44  ;;  %2182 = vpow2.f32 %v999_v13 }
 0x1ea   : > { %v2171_v31 = vpop.eup %2170  ;;  %2184 = vpow2.f32 %v997_v59 }
 0x1eb   : > { %1271 = vmatmul.mubr.f32.gmra.mxu1 %v2161_v56  ;;  %v1003_v54 = vmul.f32 1.442695, %v878_v45  ;;  %v1001_v18 = vmul.f32 1.442695, %v877_v47  ;;  %v2173_v28 = vpop.eup %2172 }
 0x1ec   : > { %1275 = vmatprep.mubr.f32.mxu1 %v2163_v32  ;;  %v816_v15 = vpop.xlane.xlu1 %815 }
 0x1ed   : > { %v880_v14 = vsub.f32 %v2978_v25, %v816_v15  ;;  %v879_v58 = vsub.f32 %v2979_v51, %v816_v15  ;;  %2186 = vpow2.f32 %v1003_v54 }
 0x1ee   : > { %v2175_v62 = vpop.eup %2174  ;;  %2188 = vpow2.f32 %v1001_v18 }
 0x1ef   : > { %1276 = vmatmul.mubr.f32.gmra.mxu1 %v2165_v55  ;;  %v1007_v63 = vmul.f32 1.442695, %v880_v14  ;;  %v1005_v39 = vmul.f32 1.442695, %v879_v58  ;;  %v2177_v17 = vpop.eup %2176 }
 0x1f0   : > { %1280 = vmatprep.mubr.f32.mxu1 %v2167_v11 }
 0x1f1   : > { %2190 = vpow2.f32 %v1007_v63 }
 0x1f2   : > { %v2179_v46 = vpop.eup %2178  ;;  %2192 = vpow2.f32 %v1005_v39 }
 0x1f3   : > { %1281 = vmatmul.mubr.f32.gmra.mxu1 %v2169_v42  ;;  %v2181_v21 = vpop.eup %2180 }
 0x1f4   : > { %1285 = vmatprep.mubr.f32.mxu1 %v2171_v31 }
 0x1f6   : > { %v2183_v60 = vpop.eup %2182 }
 0x1f7   : > { %1286 = vmatmul.mubr.f32.gmra.mxu1 %v2173_v28  ;;  %v2185_v5 = vpop.eup %2184 }
 0x1f8   : > { %1290 = vmatprep.mubr.f32.mxu1 %v2175_v62 }
 0x1fa   : > { %v2187_v7 = vpop.eup %2186 }
 0x1fb   : > { %1291 = vmatmul.mubr.f32.gmra.mxu1 %v2177_v17  ;;  %v2189_v50 = vpop.eup %2188 }
 0x1fc   : > { %1295 = vmatprep.mubr.f32.mxu1 %v2179_v46 }
 0x1fe   : > { %v2191_v61 = vpop.eup %2190 }
 0x1ff   : > { %1296 = vmatmul.mubr.f32.gmra.mxu1 %v2181_v21  ;;  %v2193_v34 = vpop.eup %2192 }
 0x200   : > { %1300 = vmatprep.mubr.f32.mxu1 %v2183_v60 }
 0x203   : > { %1301 = vmatmul.mubr.f32.gmra.mxu1 %v2185_v5 }
 0x204   : > { %1305 = vmatprep.mubr.f32.mxu1 %v2187_v7 }
 0x207   : > { %1306 = vmatmul.mubr.f32.gmra.mxu1 %v2189_v50 }
 0x208   : > { %1310 = vmatprep.mubr.f32.mxu1 %v2191_v61 }
 0x20b   : > { %1311 = vmatmul.mubr.f32.gmra.mxu1 %v2193_v34 }
 0x24f   : > { %v2665_v2 = vpop.f32.mrf.mxu1 }
 0x251   : > { %v1159_v24 = vpop.f32.mrf.mxu1 }
 0x253   : > { %v2667_v48 = vpop.f32.mrf.mxu1 }
 0x255   : > { %v1164_v3 = vpop.f32.mrf.mxu1 }
 0x257   : > { %v2669_v38 = vpop.f32.mrf.mxu1 }
 0x259   : > { %v1169_v49 = vpop.f32.mrf.mxu1 }
 0x25b   : > { %v2671_v1 = vpop.f32.mrf.mxu1 }
 0x25d   : > { %v1174_v23 = vpop.f32.mrf.mxu1 }
 0x25f   : > { %v2673_v10 = vpop.f32.mrf.mxu1 }
 0x261   : > { %v1179_v27 = vpop.f32.mrf.mxu1 }
 0x263   : > { %v2675_v6 = vpop.f32.mrf.mxu1 }
 0x265   : > { %v1184_v53 = vpop.f32.mrf.mxu1 }
 0x267   : > { %v2677_v19 = vpop.f32.mrf.mxu1 }
 0x269   : > { %v1189_v37 = vpop.f32.mrf.mxu1 }
 0x26b   : > { %v2679_v26 = vpop.f32.mrf.mxu1 }
 0x26d   : > { %v1194_v57 = vpop.f32.mrf.mxu1 }
 0x26f   : > { %v2681_v30 = vpop.f32.mrf.mxu1 }
 0x271   : > { %v1199_v4 = vpop.f32.mrf.mxu1 }
 0x273   : > { %v2683_v0 = vpop.f32.mrf.mxu1 }
 0x275   : > { %v1204_v9 = vpop.f32.mrf.mxu1 }
 0x277   : > { %v2685_v52 = vpop.f32.mrf.mxu1 }
 0x279   : > { %v1209_v29 = vpop.f32.mrf.mxu1 }
 0x27b   : > { %v2687_v41 = vpop.f32.mrf.mxu1 }
 0x27d   : > { %v1214_v33 = vpop.f32.mrf.mxu1 }
 0x27f   : > { %v2689_v56 = vpop.f32.mrf.mxu1 }
 0x281   : > { %v1219_v40 = vpop.f32.mrf.mxu1 }
 0x283   : > { %v2691_v8 = vpop.f32.mrf.mxu1 }
 0x285   : > { %v1224_v12 = vpop.f32.mrf.mxu1 }
 0x287   : > { %v2693_v32 = vpop.f32.mrf.mxu1 }
 0x289   : > { %v1229_v44 = vpop.f32.mrf.mxu1 }
 0x28b   : > { %v2695_v36 = vpop.f32.mrf.mxu1 }
 0x28c   : > { %2194 = vrcp.f32 %v2695_v36 }
 0x28d   : > { %v1234_v43 = vpop.f32.mrf.mxu1 }
 0x28f   : > { %v2698_v22 = vpop.f32.mrf.mxu1 }
 0x291   : > { %v1239_v55 = vpop.f32.mrf.mxu1 }
 0x293   : > { %v2700_v13 = vpop.f32.mrf.mxu1 }
 0x295   : > { %v1244_v35 = vpop.f32.mrf.mxu1 }
 0x297   : > { %v2702_v45 = vpop.f32.mrf.mxu1 }
 0x299   : > { %v2195_v11 = vpop.eup %2194  ;;  %v1249_v15 = vpop.f32.mrf.mxu1 }
 0x29a   : > { %1425 = vperm.xlu1 %2039, %v2195_v11  }
 0x29b   : > { %v2704_v59 = vpop.f32.mrf.mxu1 }
 0x29d   : > { %v1254_v16 = vpop.f32.mrf.mxu1 }
 0x29f   : > { %v2706_v47 = vpop.f32.mrf.mxu1 }
 0x2a1   : > { %v1259_v42 = vpop.f32.mrf.mxu1 }
 0x2a3   : > { %v2708_v54 = vpop.f32.mrf.mxu1 }
 0x2a5   : > { %v1264_v25 = vpop.f32.mrf.mxu1 }
 0x2a7   : > { %v2710_v14 = vpop.f32.mrf.mxu1 }
 0x2a9   : > { %v1269_v31 = vpop.f32.mrf.mxu1 }
 0x2ab   : > { %v2712_v18 = vpop.f32.mrf.mxu1 }
 0x2ad   : > { %v1274_v51 = vpop.f32.mrf.mxu1 }
 0x2af   : > { %v2714_v58 = vpop.f32.mrf.mxu1 }
 0x2b1   : > { %v1279_v28 = vpop.f32.mrf.mxu1 }
 0x2b3   : > { %v2716_v63 = vpop.f32.mrf.mxu1 }
 0x2b5   : > { %v1284_v62 = vpop.f32.mrf.mxu1 }
 0x2b7   : > { %v2718_v39 = vpop.f32.mrf.mxu1 }
 0x2b9   : > { %v1289_v17 = vpop.f32.mrf.mxu1 }
 0x2bb   : > { %v2720_v46 = vpop.f32.mrf.mxu1 }
 0x2bd   : > { %v1294_v21 = vpop.f32.mrf.mxu1 }
 0x2bf   : > { %v2722_v60 = vpop.f32.mrf.mxu1 }
 0x2c1   : > { %v1299_v5 = vpop.f32.mrf.mxu1 }
 0x2c2   : > { %v2980_v5 = vmov 0  }
 0x2c3   : > { %v2724_v7 = vpop.f32.mrf.mxu1 }
 0x2c5   : > { %v1304_v50 = vpop.f32.mrf.mxu1 }
 0x2c7   : > { %v2726_v61 = vpop.f32.mrf.mxu1 }
 0x2c8   : > { %2196 = vrcp.f32 %v2726_v61 }
 0x2c9   : > { %v1309_v34 = vpop.f32.mrf.mxu1  ;;  %2198 = vrcp.f32 %v2693_v32 }
 0x2cb   : > { %v2730_v20 = vpop.f32.mrf.mxu1 }
 0x2cc   : > { %2200 = vrcp.f32 %v2730_v20 }
 0x2cd   : > { %v1314_v24 = vpop.f32.mrf.mxu1  ;;  %2202 = vrcp.f32 %v2687_v41 }
 0x2ce   : > { %2204 = vrcp.f32 %v2724_v7 }
 0x2cf   : > { %2206 = vrcp.f32 %v2685_v52 }
 0x2d0   : > { %2208 = vrcp.f32 %v2691_v8 }
 0x2d1   : > { %2210 = vrcp.f32 %v2683_v0 }
 0x2d2   : > { %2212 = vrcp.f32 %v2722_v60 }
 0x2d3   : > { %2214 = vrcp.f32 %v2681_v30 }
 0x2d4   : > { %2216 = vrcp.f32 %v2689_v56 }
 0x2d5   : > { %v2197_v3 = vpop.eup %2196  ;;  %2218 = vrcp.f32 %v2679_v26 }
 0x2d6   : > { %1500 = vperm.xlu1 %2039, %v2197_v3   ;;  %v2199_v49 = vpop.eup %2198  ;;  %2220 = vrcp.f32 %v2720_v46  ;;  %v2765_v3 = vld [vmem:[%s2930_s5 + $0x10] sm:$0xff] }
 0x2d7   : > { %2222 = vrcp.f32 %v2677_v19  ;;  %1989 = vmatprep.mubr.msk.f32.mxu1 %vm1568_vm3, %v2765_v3 }
 0x2d8   : > { %2224 = vrcp.f32 %v2718_v39 }
 0x2d9   : > { %v2201_v23 = vpop.eup %2200  ;;  %2226 = vrcp.f32 %v2675_v6 }
 0x2da   : > { %1420 = vperm.xlu1 %2039, %v2199_v49   ;;  %1505 = vperm.xlu0 %2038, %v2201_v23   ;;  %v2203_v27 = vpop.eup %2202  ;;  %2228 = vrcp.f32 %v2716_v63  ;;  %v2772_v49 = vld [vmem:[%s2930_s5] sm:$0xff] }
 0x2db   : > { %v2205_v53 = vpop.eup %2204  ;;  %2230 = vrcp.f32 %v2673_v10  ;;  %1985 = vmatprep.mubr.msk.f32.mxu0 %vm1568_vm3, %v2772_v49  ;;  %v1544_v23 = vld [vmem:[%s2931_s6] sm:$0xff] }
 0x2dc   : > { %v2207_v37 = vpop.eup %2206  ;;  %2232 = vrcp.f32 %v2714_v58 }
 0x2dd   : > { %v2209_v57 = vpop.eup %2208  ;;  %2234 = vrcp.f32 %v2671_v1 }
 0x2de   : > { %1495 = vperm.xlu1 %2039, %v2205_v53   ;;  %1405 = vperm.xlu0 %2038, %v2203_v27   ;;  %v2211_v4 = vpop.eup %2210  ;;  %2236 = vrcp.f32 %v2712_v18  ;;  %v1545_v27 = vld [vmem:[%s2931_s6 + $0x8] sm:$0xff]  ;;  %v1546_v53 = vld [vmem:[%s2931_s6 + $0x10] sm:$0xff] }
 0x2df   : > { %v2213_v9 = vpop.eup %2212  ;;  %2238 = vrcp.f32 %v2669_v38 }
 0x2e0   : > { %v2215_v29 = vpop.eup %2214  ;;  %2240 = vrcp.f32 %v2710_v14 }
 0x2e1   : > { %v2217_v33 = vpop.eup %2216  ;;  %2242 = vrcp.f32 %v2667_v48 }
 0x2e2   : > { %1415 = vperm.xlu1 %2039, %v2209_v57   ;;  %1400 = vperm.xlu0 %2038, %v2207_v37   ;;  %v2219_v40 = vpop.eup %2218  ;;  %2244 = vrcp.f32 %v2708_v54  ;;  %v1547_v37 = vld [vmem:[%s2931_s6 + $0x18] sm:$0xff] }
 0x2e3   : > { %v2221_v12 = vpop.eup %2220  ;;  %2246 = vrcp.f32 %v2665_v2 }
 0x2e4   : > { %v2223_v44 = vpop.eup %2222  ;;  %2248 = vrcp.f32 %v2706_v47 }
 0x2e5   : > { %v2225_v43 = vpop.eup %2224  ;;  %2250 = vrcp.f32 %v2704_v59 }
 0x2e6   : > { %1490 = vperm.xlu1 %2039, %v2213_v9   ;;  %1395 = vperm.xlu0 %2038, %v2211_v4   ;;  %v2227_v55 = vpop.eup %2226  ;;  %2252 = vrcp.f32 %v2702_v45 }
 0x2e7   : > { %v2229_v35 = vpop.eup %2228  ;;  %2254 = vrcp.f32 %v2700_v13 }
 0x2e8   : > { %v2231_v11 = vpop.eup %2230  ;;  %2256 = vrcp.f32 %v2698_v22 }
 0x2e9   : > { %v2233_v15 = vpop.eup %2232 }
 0x2ea   : > { %1410 = vperm.xlu1 %2039, %v2217_v33   ;;  %1390 = vperm.xlu0 %2038, %v2215_v29   ;;  %v2235_v16 = vpop.eup %2234 }
 0x2eb   : > { %v2237_v42 = vpop.eup %2236 }
 0x2ec   : > { %v2239_v25 = vpop.eup %2238 }
 0x2ed   : > { %v2241_v31 = vpop.eup %2240 }
 0x2ee   : > { %1485 = vperm.xlu1 %2039, %v2221_v12   ;;  %1385 = vperm.xlu0 %2038, %v2219_v40   ;;  %v2243_v51 = vpop.eup %2242 }
 0x2ef   : > { %v2245_v28 = vpop.eup %2244 }
 0x2f0   : > { %v2247_v62 = vpop.eup %2246 }
 0x2f1   : > { %v2249_v17 = vpop.eup %2248 }
 0x2f2   : > { %1480 = vperm.xlu1 %2039, %v2225_v43   ;;  %1380 = vperm.xlu0 %2038, %v2223_v44   ;;  %v2251_v21 = vpop.eup %2250 }
 0x2f3   : > { %v2253_v50 = vpop.eup %2252 }
 0x2f4   : > { %v2255_v34 = vpop.eup %2254 }
 0x2f5   : > { %v2257_v24 = vpop.eup %2256 }
 0x2f6   : > { %1475 = vperm.xlu1 %2039, %v2229_v35   ;;  %1375 = vperm.xlu0 %2038, %v2227_v55  }
 0x2fa   : > { %1470 = vperm.xlu1 %2039, %v2233_v15   ;;  %1370 = vperm.xlu0 %2038, %v2231_v11  }
 0x2fe   : > { %1465 = vperm.xlu1 %2039, %v2237_v42   ;;  %1365 = vperm.xlu0 %2038, %v2235_v16  }
 0x302   : > { %1460 = vperm.xlu1 %2039, %v2241_v31   ;;  %1360 = vperm.xlu0 %2038, %v2239_v25  }
 0x306   : > { %1455 = vperm.xlu1 %2039, %v2245_v28   ;;  %1355 = vperm.xlu0 %2038, %v2243_v51  }
 0x30a   : > { %1450 = vperm.xlu1 %2039, %v2249_v17   ;;  %1350 = vperm.xlu0 %2038, %v2247_v62  }
 0x30e   : > { %1445 = vperm.xlu1 %2039, %v2251_v21   ;;  %2041 = vset.pattern.permute.xlu0 %v2980_v5 }
 0x30f   : > { %1555 = vperm.xlu0 %2041, %v1545_v27  }
 0x312   : > { %1440 = vperm.xlu1 %2039, %v2253_v50  }
 0x315   : > { %v1426_v57 = vpop.permute.xlu1 %1425 }
 0x316   : > { %1435 = vperm.xlu1 %2039, %v2255_v34   ;;  %v1523_v40 = vmul.f32 %v1426_v57, %v2695_v36 }
 0x31a   : > { %1430 = vperm.xlu1 %2039, %v2257_v24  }
 0x31e   : > { %2040 = vset.pattern.permute.xlu1 %v2980_v5 }
 0x31f   : > { %1550 = vperm.xlu1 %2040, %v1544_v23  }
 0x323   : > { %1560 = vperm.xlu1 %2040, %v1546_v53  }
 0x327   : > { %1565 = vperm.xlu1 %2040, %v1547_v37  }
 0x351   : > { %v1501_v4 = vpop.permute.xlu1 %1500 }
 0x352   : > { %v1538_v12 = vmul.f32 %v1501_v4, %v2726_v61 }
 0x355   : > { %v1506_v9 = vpop.permute.xlu0 %1505  ;;  %v1421_v29 = vpop.permute.xlu1 %1420 }
 0x356   : > { %v1539_v33 = vmul.f32 %v1506_v9, %v2730_v20  ;;  %v1522_v20 = vmul.f32 %v1421_v29, %v2693_v32 }
 0x358   : > { %1953 = vmatprep.subr.msk.mxu0 %vm1568_vm3, %v1539_v33  ;;  %1993 = vmatprep.subr.msk.mxu1 %vm1568_vm3, %v1539_v33 }
 0x359   : > { %v1406_v44 = vpop.permute.xlu0 %1405  ;;  %1954 = vmatpush3.xpose.msk.msra.mxu0 %vm1568_vm3, %v1523_v40  ;;  %2009 = vmatpush3.xpose.msk.msra.mxu1 %vm1568_vm3, %v1523_v40  ;;  %v1496_v43 = vpop.permute.xlu1 %1495 }
 0x35a   : > { %1955 = vmatprep.subr.msk.mxu0 %vm1568_vm3, %v1538_v12  ;;  %1994 = vmatprep.subr.msk.mxu1 %vm1568_vm3, %v1538_v12  ;;  %v1537_v36 = vmul.f32 %v1496_v43, %v2724_v7  ;;  %v1519_v51 = vmul.f32 %v1406_v44, %v2687_v41 }
 0x35d   : > { %v1401_v55 = vpop.permute.xlu0 %1400  ;;  %1956 = vmatpush3.xpose.msk.msra.mxu0 %vm1568_vm3, %v1522_v20  ;;  %2010 = vmatpush3.xpose.msk.msra.mxu1 %vm1568_vm3, %v1522_v20  ;;  %v1416_v61 = vpop.permute.xlu1 %1415 }
 0x35e   : > { %v1521_v35 = vmul.f32 %v1416_v61, %v2691_v8  ;;  %1957 = vmatprep.subr.msk.mxu0 %vm1568_vm3, %v1537_v36  ;;  %1995 = vmatprep.subr.msk.mxu1 %vm1568_vm3, %v1537_v36  ;;  %v1518_v28 = vmul.f32 %v1401_v55, %v2685_v52  ;;  %v2258_v61 = vld [vmem:[%s2347_s14 + $0x20] sm:$0xff] }
 0x361   : > { %v1396_v11 = vpop.permute.xlu0 %1395  ;;  %1958 = vmatpush3.xpose.msk.msra.mxu0 %vm1568_vm3, %v1521_v35  ;;  %2011 = vmatpush3.xpose.msk.msra.mxu1 %vm1568_vm3, %v1521_v35  ;;  %v1491_v32 = vpop.permute.xlu1 %1490 }
 0x362   : > { %v1536_v7 = vmul.f32 %v1491_v32, %v2722_v60  ;;  %v1517_v17 = vmul.f32 %v1396_v11, %v2683_v0  ;;  %v2259_v11 = vld [vmem:[%s2347_s14] sm:$0xff] }
 0x364   : > { %1959 = vmatprep.subr.msk.mxu0 %vm1568_vm3, %v1536_v7  ;;  %1996 = vmatprep.subr.msk.mxu1 %vm1568_vm3, %v1536_v7 }
 0x365   : > { %v1391_v15 = vpop.permute.xlu0 %1390  ;;  %v1411_v16 = vpop.permute.xlu1 %1410 }
 0x366   : > { %v1520_v8 = vmul.f32 %v1411_v16, %v2689_v56  ;;  %v1516_v5 = vmul.f32 %v1391_v15, %v2681_v30 }
 0x368   : > { %1960 = vmatpush3.xpose.msk.msra.mxu0 %vm1568_vm3, %v1520_v8  ;;  %2012 = vmatpush3.xpose.msk.msra.mxu1 %vm1568_vm3, %v1520_v8 }
 0x369   : > { %v1486_v42 = vpop.permute.xlu1 %1485  ;;  %v1386_v25 = vpop.permute.xlu0 %1385 }
 0x36a   : > { %v1535_v31 = vmul.f32 %v1486_v42, %v2720_v46  ;;  %v1515_v50 = vmul.f32 %v1386_v25, %v2679_v26  ;;  %v2260_v42 = vld [vmem:[%s2347_s14 + $0x28] sm:$0xff] }
 0x36c   : > { %1961 = vmatprep.subr.msk.mxu0 %vm1568_vm3, %v1535_v31  ;;  %1997 = vmatprep.subr.msk.mxu1 %vm1568_vm3, %v1535_v31  ;;  %v2261_v31 = vld [vmem:[%s2347_s14 + $0x8] sm:$0xff] }
 0x36d   : > { %1962 = vmatpush3.xpose.msk.msra.mxu0 %vm1568_vm3, %v1519_v51  ;;  %2013 = vmatpush3.xpose.msk.msra.mxu1 %vm1568_vm3, %v1519_v51  ;;  %v1481_v60 = vpop.permute.xlu1 %1480  ;;  %v1381_v62 = vpop.permute.xlu0 %1380 }
 0x36e   : > { %v1534_v56 = vmul.f32 %v1481_v60, %v2718_v39  ;;  %v1514_v24 = vmul.f32 %v1381_v62, %v2677_v19 }
 0x370   : > { %1963 = vmatprep.subr.msk.mxu0 %vm1568_vm3, %v1534_v56  ;;  %1998 = vmatprep.subr.msk.mxu1 %vm1568_vm3, %v1534_v56 }
 0x371   : > { %1964 = vmatpush3.xpose.msk.msra.mxu0 %vm1568_vm3, %v1518_v28  ;;  %2014 = vmatpush3.xpose.msk.msra.mxu1 %vm1568_vm3, %v1518_v28  ;;  %v1476_v41 = vpop.permute.xlu1 %1475  ;;  %v1376_v39 = vpop.permute.xlu0 %1375 }
 0x372   : > { %v1533_v46 = vmul.f32 %v1476_v41, %v2716_v63  ;;  %v1513_v27 = vmul.f32 %v1376_v39, %v2675_v6 }
 0x374   : > { %1965 = vmatprep.subr.msk.mxu0 %vm1568_vm3, %v1533_v46  ;;  %1999 = vmatprep.subr.msk.mxu1 %vm1568_vm3, %v1533_v46  ;;  %v2262_v46 = vld [vmem:[%s2347_s14 + $0x30] sm:$0xff] }
 0x375   : > { %1966 = vmatpush3.xpose.msk.msra.mxu0 %vm1568_vm3, %v1517_v17  ;;  %2015 = vmatpush3.xpose.msk.msra.mxu1 %vm1568_vm3, %v1517_v17  ;;  %v1471_v52 = vpop.permute.xlu1 %1470  ;;  %v1371_v34 = vpop.permute.xlu0 %1370 }
 0x376   : > { %v1532_v21 = vmul.f32 %v1471_v52, %v2714_v58  ;;  %v1512_v53 = vmul.f32 %v1371_v34, %v2673_v10  ;;  %v2263_v52 = vld [vmem:[%s2347_s14 + $0x10] sm:$0xff] }
 0x378   : > { %1967 = vmatprep.subr.msk.mxu0 %vm1568_vm3, %v1532_v21  ;;  %2000 = vmatprep.subr.msk.mxu1 %vm1568_vm3, %v1532_v21 }
 0x379   : > { %1968 = vmatpush3.xpose.msk.msra.mxu0 %vm1568_vm3, %v1516_v5  ;;  %2016 = vmatpush3.xpose.msk.msra.mxu1 %vm1568_vm3, %v1516_v5  ;;  %v1466_v0 = vpop.permute.xlu1 %1465  ;;  %v2264_v5 = vld [vmem:[%s2347_s14 + $0x38] sm:$0xff] }
 0x37a   : > { %v1531_v63 = vmul.f32 %v1466_v0, %v2712_v18  ;;  %v1366_v18 = vpop.permute.xlu0 %1365 }
 0x37b   : > { %v1511_v57 = vmul.f32 %v1366_v18, %v2671_v1 }
 0x37c   : > { %1969 = vmatprep.subr.msk.mxu0 %vm1568_vm3, %v1531_v63  ;;  %2001 = vmatprep.subr.msk.mxu1 %vm1568_vm3, %v1531_v63  ;;  %v2265_v63 = vld [vmem:[%s2347_s14 + $0x18] sm:$0xff] }
 0x37d   : > { %1970 = vmatpush3.xpose.msk.msra.mxu0 %vm1568_vm3, %v1515_v50  ;;  %2017 = vmatpush3.xpose.msk.msra.mxu1 %vm1568_vm3, %v1515_v50  ;;  %v1461_v30 = vpop.permute.xlu1 %1460 }
 0x37e   : > { %v1530_v58 = vmul.f32 %v1461_v30, %v2710_v14  ;;  %v1361_v37 = vpop.permute.xlu0 %1360 }
 0x37f   : > { %v1510_v9 = vmul.f32 %v1361_v37, %v2669_v38 }
 0x380   : > { %1971 = vmatprep.subr.msk.mxu0 %vm1568_vm3, %v1530_v58  ;;  %2002 = vmatprep.subr.msk.mxu1 %vm1568_vm3, %v1530_v58 }
 0x381   : > { %1972 = vmatpush3.xpose.msk.msra.mxu0 %vm1568_vm3, %v1514_v24  ;;  %2018 = vmatpush3.xpose.msk.msra.mxu1 %vm1568_vm3, %v1514_v24  ;;  %v1456_v26 = vpop.permute.xlu1 %1455 }
 0x382   : > { %v1529_v23 = vmul.f32 %v1456_v26, %v2708_v54 }
 0x384   : > { %1973 = vmatprep.subr.msk.mxu0 %vm1568_vm3, %v1529_v23  ;;  %2003 = vmatprep.subr.msk.mxu1 %vm1568_vm3, %v1529_v23 }
 0x385   : > { %1974 = vmatpush3.xpose.msk.msra.mxu0 %vm1568_vm3, %v1513_v27  ;;  %2019 = vmatpush3.xpose.msk.msra.mxu1 %vm1568_vm3, %v1513_v27  ;;  %v1451_v19 = vpop.permute.xlu1 %1450 }
 0x386   : > { %v1528_v14 = vmul.f32 %v1451_v19, %v2706_v47  ;;  %v1356_v47 = vpop.permute.xlu0 %1355 }
 0x387   : > { %v1509_v29 = vmul.f32 %v1356_v47, %v2667_v48  ;;  %v1543_v48 = vld [vmem:[%s2930_s5 + $0x18] sm:$0xff] }
 0x388   : > { %1975 = vmatprep.subr.msk.mxu0 %vm1568_vm3, %v1528_v14  ;;  %2004 = vmatprep.subr.msk.mxu1 %vm1568_vm3, %v1528_v14 }
 0x389   : > { %1976 = vmatpush3.xpose.msk.msra.mxu0 %vm1568_vm3, %v1512_v53  ;;  %2020 = vmatpush3.xpose.msk.msra.mxu1 %vm1568_vm3, %v1512_v53  ;;  %v1446_v6 = vpop.permute.xlu1 %1445 }
 0x38a   : > { %v1527_v54 = vmul.f32 %v1446_v6, %v2704_v59  ;;  %v1351_v33 = vpop.permute.xlu0 %1350 }
 0x38b   : > { %v1508_v40 = vmul.f32 %v1351_v33, %v2665_v2 }
 0x38c   : > { %1977 = vmatprep.subr.msk.mxu0 %vm1568_vm3, %v1527_v54  ;;  %2005 = vmatprep.subr.msk.mxu1 %vm1568_vm3, %v1527_v54 }
 0x38d   : > { %1978 = vmatpush3.xpose.msk.msra.mxu0 %vm1568_vm3, %v1511_v57  ;;  %2021 = vmatpush3.xpose.msk.msra.mxu1 %vm1568_vm3, %v1511_v57  ;;  %v1441_v10 = vpop.permute.xlu1 %1440 }
 0x38e   : > { %v1526_v4 = vmul.f32 %v1441_v10, %v2702_v45  ;;  %v1556_v20 = vpop.permute.xlu0 %1555 }
 0x390   : > { %1979 = vmatprep.subr.msk.mxu0 %vm1568_vm3, %v1526_v4  ;;  %2006 = vmatprep.subr.msk.mxu1 %vm1568_vm3, %v1526_v4 }
 0x391   : > { %1980 = vmatpush3.xpose.msk.msra.mxu0 %vm1568_vm3, %v1510_v9  ;;  %2022 = vmatpush3.xpose.msk.msra.mxu1 %vm1568_vm3, %v1510_v9  ;;  %v1436_v1 = vpop.permute.xlu1 %1435 }
 0x392   : > { %v1525_v59 = vmul.f32 %v1436_v1, %v2700_v13  ;;  %v1541_v13 = vld [vmem:[%s2930_s5 + $0x8] sm:$0xff] }
 0x394   : > { %1981 = vmatprep.subr.msk.mxu0 %vm1568_vm3, %v1525_v59  ;;  %2007 = vmatprep.subr.msk.mxu1 %vm1568_vm3, %v1525_v59 }
 0x395   : > { %1982 = vmatpush3.xpose.msk.msra.mxu0 %vm1568_vm3, %v1509_v29  ;;  %2023 = vmatpush3.xpose.msk.msra.mxu1 %vm1568_vm3, %v1509_v29  ;;  %v1431_v38 = vpop.permute.xlu1 %1430 }
 0x396   : > { %v1524_v45 = vmul.f32 %v1431_v38, %v2698_v22 }
 0x398   : > { %1983 = vmatprep.subr.msk.mxu0 %vm1568_vm3, %v1524_v45  ;;  %2008 = vmatprep.subr.msk.mxu1 %vm1568_vm3, %v1524_v45 }
 0x399   : > { %1984 = vmatpush3.xpose.msk.msra.mxu0 %vm1568_vm3, %v1508_v40  ;;  %2024 = vmatpush3.xpose.msk.msra.mxu1 %vm1568_vm3, %v1508_v40 }
 0x39a   : > { %v1551_v2 = vpop.permute.xlu1 %1550 }
 0x39c   : > { %1990 = vmatmul.mubr.msk.f32.vlgmr.msra.gmra.mxu1 %vm1568_vm3, %v2765_v3  ;;  %1986 = vmatmul.mubr.msk.f32.vlgmr.msra.gmra.mxu0 %vm1568_vm3, %v2772_v49 }
 0x39d   : > { %1991 = vmatprep.mubr.msk.f32.mxu1 %vm1568_vm3, %v1543_v48  ;;  %1987 = vmatprep.mubr.msk.f32.mxu0 %vm1568_vm3, %v1541_v13 }
 0x39e   : > { %v1561_v22 = vpop.permute.xlu1 %1560 }
 0x3a0   : > { %1992 = vmatmul.mubr.msk.f32.gmra.mxu1 %vm1568_vm3, %v1543_v48  ;;  %1988 = vmatmul.mubr.msk.f32.gmra.mxu0 %vm1568_vm3, %v1541_v13 }
 0x3a2   : > { %v1566_v15 = vpop.permute.xlu1 %1565 }
 0x45c   : > { %v1755_v12 = vpop.f32.mrf.mxu1  ;;  %v1743_v44 = vpop.f32.mrf.mxu0 }
 0x45d   : > { %v1756_v43 = vadd.f32 %v1755_v12, %v1561_v22  ;;  %v1744_v3 = vadd.f32 %v1743_v44, %v1551_v2 }
 0x45e   : > { %v1757_v49 = vpop.f32.mrf.mxu1  ;;  %v1745_v36 = vpop.f32.mrf.mxu0 }
 0x45f   : > { %v1758_v55 = vadd.f32 %v1757_v49, %v1561_v22  ;;  %v1770_v35 = vadd.f32 %v2258_v61, %v1756_v43  ;;  %v1766_v32 = vadd.f32 %v2259_v11, %v1744_v3  ;;  %v1746_v7 = vadd.f32 %v1745_v36, %v1551_v2 }
 0x460   : > { %v1761_v16 = vpop.f32.mrf.mxu1  ;;  %v1749_v8 = vpop.f32.mrf.mxu0 }
 0x461   : > { %v1771_v25 = vadd.f32 %v2260_v42, %v1758_v55  ;;  %1778 = vst [vmem:[%s2904_s18 + $0x20] sm:$0xff] %v1770_v35  ;;  %1774 = vst [vmem:[%s2904_s18] sm:$0xff] %v1766_v32  ;;  %v1767_v51 = vadd.f32 %v2261_v31, %v1746_v7  ;;  %v1762_v60 = vadd.f32 %v1761_v16, %v1566_v15 }
 0x462   : > { %v1750_v56 = vadd.f32 %v1749_v8, %v1556_v20  ;;  %v1763_v28 = vpop.f32.mrf.mxu1  ;;  %v1751_v62 = vpop.f32.mrf.mxu0 }
 0x463   : > { %1779 = vst [vmem:[%s2904_s18 + $0x28] sm:$0xff] %v1771_v25  ;;  %1775 = vst [vmem:[%s2904_s18 + $0x8] sm:$0xff] %v1767_v51  ;;  %v1764_v41 = vadd.f32 %v1763_v28, %v1566_v15  ;;  %v1772_v17 = vadd.f32 %v2262_v46, %v1762_v60  ;;  %v1752_v21 = vadd.f32 %v1751_v62, %v1556_v20 }
 0x464   : > { %v1768_v39 = vadd.f32 %v2263_v52, %v1750_v56 }
 0x465   : > { %v1773_v0 = vadd.f32 %v2264_v5, %v1764_v41  ;;  %1780 = vst [vmem:[%s2904_s18 + $0x30] sm:$0xff] %v1772_v17  ;;  %v1769_v50 = vadd.f32 %v2265_v63, %v1752_v21 }
 0x466   : > { %1776 = vst [vmem:[%s2904_s18 + $0x10] sm:$0xff] %v1768_v39 }
 0x467   : > { %1781 = vst [vmem:[%s2904_s18 + $0x38] sm:$0xff] %v1773_v0  ;;  %1777 = vst [vmem:[%s2904_s18 + $0x18] sm:$0xff] %v1769_v50 }
 0x468 PF: > { %s17_s24 = sadd.s32 1, %s2272_s24  }
 0x469   : > { %p14_p4 = scmp.ge.s32.totalorder %s17_s24, 6  }
 0x46b   :  { %16 = sbr.rel (!%p14_p4) target bundleno = 1 (0x1), region = 84 }

</bundles_post_ra>
